<compile_context>
chip_gen: v7x
topology: tpu7x:2x2x1
jax: 0.10.0
libtpu: 0.0.40
codegen_flags: <defaults>
</compile_context>

<pallas_src>
import math
import jax
import jax.numpy as jnp
from jax import lax
from jax.experimental import pallas as pl
from jax.experimental.pallas import tpu as pltpu


def _round_up(x: int, m: int) -> int:
    return ((x + m - 1) // m) * m


def _pad_to(a, shape):
    pads = [(0, s - d) for d, s in zip(a.shape, shape)]
    return jnp.pad(a, pads)


def _make_agent_kernel(seq_len: int, n_layers: int):
    """Fused multi-layer tanh-RNN + linear readout kernel (one batch tile)."""

    unroll_time = seq_len <= 32

    def kernel(*refs):
        # ref order: x, [w_ih, w_hh, b] * n_layers, w_ro, b_ro,
        #            out_ref, h_out_ref, y_scratch
        x_ref = refs[0]
        idx = 1
        layers = []
        for _ in range(n_layers):
            layers.append((refs[idx], refs[idx + 1], refs[idx + 2]))
            idx += 3
        w_ro_ref, b_ro_ref = refs[idx], refs[idx + 1]
        out_ref, h_out_ref = refs[idx + 2], refs[idx + 3]
        y_ref = refs[idx + 4]          # scratch (S, Bt, Hp) f32

        S = seq_len
        Bt = y_ref.shape[1]            # batch tile (multiple of 8, or == B)
        Hp = y_ref.shape[2]            # padded hidden width (multiple of 128)
        Np = out_ref.shape[2]          # padded readout width (multiple of 128)

        for l, (w_ih_ref, w_hh_ref, b_ref) in enumerate(layers):
            w_ih = w_ih_ref[...]
            w_hh = w_hh_ref[...]
            b = b_ref[...]                                   # (1, Hp)

            # --- Hoisted input projection: one big matmul over all timesteps.
            inp = x_ref[...] if l == 0 else y_ref[...]       # (S, Bt, K)
            k = inp.shape[-1]
            pre = jnp.dot(inp.reshape(S * Bt, k), w_ih,
                          preferred_element_type=jnp.float32) + b
            y_ref[...] = pre.reshape(S, Bt, Hp)

            # --- Serial recurrence: h_t = tanh(pre_t + h_{t-1} @ W_hh).
            def step(t, h):
                h_new = jnp.tanh(
                    y_ref[t]
                    + jnp.dot(h, w_hh, preferred_element_type=jnp.float32))
                y_ref[t] = h_new
                return h_new

            h0 = jnp.zeros((Bt, Hp), jnp.float32)
            h_last = lax.fori_loop(0, S, step, h0, unroll=unroll_time)
            h_out_ref[l] = h_last

        # --- Readout: single batched matmul over the whole sequence.
        w_ro = w_ro_ref[...]
        b_ro = b_ro_ref[...]                                 # (1, Np)
        y_all = y_ref[...].reshape(S * Bt, Hp)
        out = jnp.dot(y_all, w_ro, preferred_element_type=jnp.float32) + b_ro
        out_ref[...] = out.reshape(S, Bt, Np).astype(out_ref.dtype)

    return kernel


def _pick_batch_tile(B: int) -> int:
    if B <= 64:
        return B
    for d in (64, 32, 16, 8):
        if B % d == 0:
            return d
    return B


def agent_forward(x_in, layer_params, readout_params, *, batch_tile=None):
    """Pallas-backed Agent.forward(x_in) -> (output, h)."""
    S, B, n_in = x_in.shape
    n_layers = len(layer_params)
    H = layer_params[0][1].shape[0]
    w_ro, b_ro = readout_params
    n_out = w_ro.shape[1]

    Hp = _round_up(H, 128)           # lane-dense hidden width
    Np = _round_up(n_out, 128)       # lane-dense readout width

    tb = batch_tile if batch_tile is not None else _pick_batch_tile(B)
    assert B % tb == 0 and (tb % 8 == 0 or tb == B), (B, tb)

    # Zero-pad parameters. Padded hidden units receive tanh(0) = 0 and feed
    # only zero weights downstream, so the real outputs are bit-identical.
    padded_layers = []
    for l, (w_ih, w_hh, b) in enumerate(layer_params):
        in_pad = n_in if l == 0 else Hp
        padded_layers.append((
            _pad_to(w_ih, (in_pad, Hp)),
            _pad_to(w_hh, (Hp, Hp)),
            _pad_to(b, (1, Hp)),
        ))
    w_ro_p = _pad_to(w_ro, (Hp, Np))
    b_ro_p = _pad_to(b_ro, (1, Np))

    args = [x_in.astype(jnp.float32)]
    in_specs = [pl.BlockSpec((S, tb, n_in), lambda i: (0, i, 0))]
    for (w_ih_p, w_hh_p, b_p) in padded_layers:
        args += [w_ih_p, w_hh_p, b_p]
        in_specs += [
            pl.BlockSpec(w_ih_p.shape, lambda i: (0, 0)),
            pl.BlockSpec(w_hh_p.shape, lambda i: (0, 0)),
            pl.BlockSpec(b_p.shape, lambda i: (0, 0)),
        ]
    args += [w_ro_p, b_ro_p]
    in_specs += [
        pl.BlockSpec(w_ro_p.shape, lambda i: (0, 0)),
        pl.BlockSpec(b_ro_p.shape, lambda i: (0, 0)),
    ]

    out_shape = (
        jax.ShapeDtypeStruct((S, B, Np), jnp.float32),
        jax.ShapeDtypeStruct((n_layers, B, Hp), jnp.float32),
    )
    out_specs = (
        pl.BlockSpec((S, tb, Np), lambda i: (0, i, 0)),
        pl.BlockSpec((n_layers, tb, Hp), lambda i: (0, i, 0)),
    )

    out_p, h_p = pl.pallas_call(
        _make_agent_kernel(S, n_layers),
        out_shape=out_shape,
        grid_spec=pltpu.PrefetchScalarGridSpec(
            num_scalar_prefetch=0,
            grid=(B // tb,),
            in_specs=in_specs,
            out_specs=out_specs,
            scratch_shapes=[pltpu.VMEM((S, tb, Hp), jnp.float32)],
        ),
        compiler_params=pltpu.CompilerParams(
            dimension_semantics=("parallel",),
            vmem_limit_bytes=64 << 20),
    )(*args)

    # Slice the lane padding back off.
    return out_p[:, :, :n_out], h_p[:, :, :H]


def agent_reference(x_in, layer_params, readout_params):
    """Pure-JAX reference (same math as torch nn.RNN + Linear readout)."""
    S, B, _ = x_in.shape
    y = x_in
    h_finals = []
    for (w_ih, w_hh, b) in layer_params:
        H = w_hh.shape[0]
        h = jnp.zeros((B, H), jnp.float32)
        outs = []
        for t in range(S):
            h = jnp.tanh(y[t] @ w_ih + h @ w_hh + b)
            outs.append(h)
        y = jnp.stack(outs)
        h_finals.append(h)
    w_ro, b_ro = readout_params
    return y @ w_ro + b_ro, jnp.stack(h_finals)


def init_agent_params(key, n_in, n_hidden, n_layers, n_out):
    """Deterministic parameter init mirroring Agent.__init__ shapes/inits.

    Cell weights: xavier_normal with gain('tanh') = 5/3 (as in the module).
    Readout:      kaiming_uniform(nonlinearity='relu') weight, PyTorch-default bias.
    Weights are returned pre-transposed to (in_features, out_features); the
    per-layer bias is b_ih + b_hh folded into a single (1, H) vector.
    """
    gain = 5.0 / 3.0
    layer_params = []
    for l in range(n_layers):
        in_l = n_in if l == 0 else n_hidden
        key, k1, k2, k3, k4 = jax.random.split(key, 5)
        std_ih = gain * math.sqrt(2.0 / (in_l + n_hidden))
        std_hh = gain * math.sqrt(2.0 / (n_hidden + n_hidden))
        w_ih = std_ih * jax.random.normal(k1, (in_l, n_hidden), jnp.float32)
        w_hh = std_hh * jax.random.normal(k2, (n_hidden, n_hidden), jnp.float32)
        bound = 1.0 / math.sqrt(n_hidden)   # PyTorch default RNN bias init
        b_ih = jax.random.uniform(k3, (n_hidden,), jnp.float32, -bound, bound)
        b_hh = jax.random.uniform(k4, (n_hidden,), jnp.float32, -bound, bound)
        layer_params.append((w_ih, w_hh, (b_ih + b_hh).reshape(1, n_hidden)))

    key, kw, kb = jax.random.split(key, 3)
    ro_bound = math.sqrt(6.0 / n_hidden)    # kaiming_uniform, fan_in = n_hidden
    w_ro = jax.random.uniform(kw, (n_hidden, n_out), jnp.float32,
                              -ro_bound, ro_bound)
    b_bound = 1.0 / math.sqrt(n_hidden)     # PyTorch default Linear bias init
    b_ro = jax.random.uniform(kb, (1, n_out), jnp.float32, -b_bound, b_bound)
    return layer_params, (w_ro, b_ro)


if __name__ == "__main__":
    # Small shapes consistent with the module's forward:
    #   x_in: (seq=8, batch=8, n_in=32); n_hidden=32, n_layers=2, n_out=16
    S, B, N_IN, N_HID, N_LAYERS, N_OUT = 8, 8, 32, 32, 2, 16

    key = jax.random.PRNGKey(0)
    key, kx = jax.random.split(key)
    x_in = jax.random.normal(kx, (S, B, N_IN), jnp.float32)

    layer_params, readout_params = init_agent_params(
        key, N_IN, N_HID, N_LAYERS, N_OUT)

    out, h = agent_forward(x_in, layer_params, readout_params)
    out = jax.block_until_ready(out)
    h = jax.block_until_ready(h)

    out_ref, h_ref = agent_reference(x_in, layer_params, readout_params)

    assert out.shape == (S, B, N_OUT), out.shape
    assert h.shape == (N_LAYERS, B, N_HID), h.shape
    assert jnp.allclose(out, out_ref, rtol=1e-4, atol=1e-4)
    assert jnp.allclose(h, h_ref, rtol=1e-4, atol=1e-4)

    print("KERNEL_OK")
</pallas_src>

<mosaic_0001>
module attributes {stable_mosaic.version = 11 : i64} {
  func.func @kernel(%arg0: i32, %arg1: memref<8x8x32xf32, #tpu.memory_space<vmem>>, %arg2: memref<32x128xf32, #tpu.memory_space<vmem>>, %arg3: memref<128x128xf32, #tpu.memory_space<vmem>>, %arg4: memref<1x128xf32, #tpu.memory_space<vmem>>, %arg5: memref<128x128xf32, #tpu.memory_space<vmem>>, %arg6: memref<128x128xf32, #tpu.memory_space<vmem>>, %arg7: memref<1x128xf32, #tpu.memory_space<vmem>>, %arg8: memref<128x128xf32, #tpu.memory_space<vmem>>, %arg9: memref<1x128xf32, #tpu.memory_space<vmem>>, %arg10: memref<8x8x128xf32, #tpu.memory_space<vmem>>, %arg11: memref<2x8x128xf32, #tpu.memory_space<vmem>>, %arg12: memref<8x8x128xf32, #tpu.memory_space<vmem>>) attributes {dimension_semantics = [#tpu.dimension_semantics<parallel>], iteration_bounds = array<i64: 1>, scalar_prefetch = 0 : i64, scratch_operands = 1 : i64, tpu.core_type = #tpu.core_type<tc>, window_params = [{transform_indices = @transform_0, window_bounds = array<i64: 8, 8, 32>}, {pipeline_mode = #tpu.pipeline_mode<synchronous>, transform_indices = @transform_1, window_bounds = array<i64: 32, 128>}, {pipeline_mode = #tpu.pipeline_mode<synchronous>, transform_indices = @transform_2, window_bounds = array<i64: 128, 128>}, {pipeline_mode = #tpu.pipeline_mode<synchronous>, transform_indices = @transform_3, window_bounds = array<i64: 1, 128>}, {pipeline_mode = #tpu.pipeline_mode<synchronous>, transform_indices = @transform_4, window_bounds = array<i64: 128, 128>}, {pipeline_mode = #tpu.pipeline_mode<synchronous>, transform_indices = @transform_5, window_bounds = array<i64: 128, 128>}, {pipeline_mode = #tpu.pipeline_mode<synchronous>, transform_indices = @transform_6, window_bounds = array<i64: 1, 128>}, {pipeline_mode = #tpu.pipeline_mode<synchronous>, transform_indices = @transform_7, window_bounds = array<i64: 128, 128>}, {pipeline_mode = #tpu.pipeline_mode<synchronous>, transform_indices = @transform_8, window_bounds = array<i64: 1, 128>}, {transform_indices = @transform_9, window_bounds = array<i64: 8, 8, 128>}, {transform_indices = @transform_10, window_bounds = array<i64: 2, 8, 128>}]} {
    %c0 = arith.constant 0 : index
    %c0_0 = arith.constant 0 : index
    %0 = vector.load %arg2[%c0, %c0_0] : memref<32x128xf32, #tpu.memory_space<vmem>>, vector<32x128xf32>
    %c0_1 = arith.constant 0 : index
    %c0_2 = arith.constant 0 : index
    %1 = vector.load %arg3[%c0_1, %c0_2] : memref<128x128xf32, #tpu.memory_space<vmem>>, vector<128x128xf32>
    %c0_3 = arith.constant 0 : index
    %c0_4 = arith.constant 0 : index
    %2 = vector.load %arg4[%c0_3, %c0_4] : memref<1x128xf32, #tpu.memory_space<vmem>>, vector<1x128xf32>
    %c0_5 = arith.constant 0 : index
    %c0_6 = arith.constant 0 : index
    %c0_7 = arith.constant 0 : index
    %3 = vector.load %arg1[%c0_5, %c0_6, %c0_7] : memref<8x8x32xf32, #tpu.memory_space<vmem>>, vector<8x8x32xf32>
    %4 = vector.shape_cast %3 : vector<8x8x32xf32> to vector<64x32xf32>
    %cst = arith.constant dense<0.000000e+00> : vector<64x128xf32>
    %5 = tpu.matmul %4, %0, %cst {dimension_numbers = #tpu.dot_dimension_numbers<[1], [0], [0], [1], [0, 0, 1, 1], [], []>} : vector<64x32xf32>, vector<32x128xf32>, vector<64x128xf32> -> vector<64x128xf32>
    %6 = vector.broadcast %2 : vector<1x128xf32> to vector<64x128xf32>
    %7 = arith.addf %5, %6 : vector<64x128xf32>
    %8 = vector.shape_cast %7 : vector<64x128xf32> to vector<8x8x128xf32>
    %c0_8 = arith.constant 0 : index
    %c0_9 = arith.constant 0 : index
    %c0_10 = arith.constant 0 : index
    %9 = vector.load %arg12[%c0_8, %c0_9, %c0_10] : memref<8x8x128xf32, #tpu.memory_space<vmem>>, vector<8x8x128xf32>
    tpu.vector_store %arg12[%c0_8, %c0_9, %c0_10], %8 {strides = array<i32>} : memref<8x8x128xf32, #tpu.memory_space<vmem>>, vector<8x8x128xf32>,
    %cst_11 = arith.constant 0.000000e+00 : f32
    %10 = vector.broadcast %cst_11 : f32 to vector<8x128xf32>
    %c0_i32 = arith.constant 0 : i32
    %11 = arith.index_cast %c0_i32 : i32 to index
    %c0_12 = arith.constant 0 : index
    %c0_13 = arith.constant 0 : index
    %12 = vector.load %arg12[%11, %c0_12, %c0_13] : memref<8x8x128xf32, #tpu.memory_space<vmem>>, vector<1x8x128xf32>
    %13 = vector.shape_cast %12 : vector<1x8x128xf32> to vector<8x128xf32>
    %cst_14 = arith.constant dense<0.000000e+00> : vector<8x128xf32>
    %14 = tpu.matmul %10, %1, %cst_14 {dimension_numbers = #tpu.dot_dimension_numbers<[1], [0], [0], [1], [0, 0, 1, 1], [], []>} : vector<8x128xf32>, vector<128x128xf32>, vector<8x128xf32> -> vector<8x128xf32>
    %15 = arith.addf %13, %14 : vector<8x128xf32>
    %16 = math.tanh %15 : vector<8x128xf32>
    %17 = arith.index_cast %c0_i32 : i32 to index
    %c0_15 = arith.constant 0 : index
    %c0_16 = arith.constant 0 : index
    %18 = vector.load %arg12[%17, %c0_15, %c0_16] : memref<8x8x128xf32, #tpu.memory_space<vmem>>, vector<1x8x128xf32>
    %19 = vector.shape_cast %18 : vector<1x8x128xf32> to vector<8x128xf32>
    %20 = vector.shape_cast %16 : vector<8x128xf32> to vector<1x8x128xf32>
    tpu.vector_store %arg12[%17, %c0_15, %c0_16], %20 {strides = array<i32>} : memref<8x8x128xf32, #tpu.memory_space<vmem>>, vector<1x8x128xf32>,
    %c1_i32 = arith.constant 1 : i32
    %21 = arith.index_cast %c1_i32 : i32 to index
    %c0_17 = arith.constant 0 : index
    %c0_18 = arith.constant 0 : index
    %22 = vector.load %arg12[%21, %c0_17, %c0_18] : memref<8x8x128xf32, #tpu.memory_space<vmem>>, vector<1x8x128xf32>
    %23 = vector.shape_cast %22 : vector<1x8x128xf32> to vector<8x128xf32>
    %cst_19 = arith.constant dense<0.000000e+00> : vector<8x128xf32>
    %24 = tpu.matmul %16, %1, %cst_19 {dimension_numbers = #tpu.dot_dimension_numbers<[1], [0], [0], [1], [0, 0, 1, 1], [], []>} : vector<8x128xf32>, vector<128x128xf32>, vector<8x128xf32> -> vector<8x128xf32>
    %25 = arith.addf %23, %24 : vector<8x128xf32>
    %26 = math.tanh %25 : vector<8x128xf32>
    %27 = arith.index_cast %c1_i32 : i32 to index
    %c0_20 = arith.constant 0 : index
    %c0_21 = arith.constant 0 : index
    %28 = vector.load %arg12[%27, %c0_20, %c0_21] : memref<8x8x128xf32, #tpu.memory_space<vmem>>, vector<1x8x128xf32>
    %29 = vector.shape_cast %28 : vector<1x8x128xf32> to vector<8x128xf32>
    %30 = vector.shape_cast %26 : vector<8x128xf32> to vector<1x8x128xf32>
    tpu.vector_store %arg12[%27, %c0_20, %c0_21], %30 {strides = array<i32>} : memref<8x8x128xf32, #tpu.memory_space<vmem>>, vector<1x8x128xf32>,
    %c2_i32 = arith.constant 2 : i32
    %31 = arith.index_cast %c2_i32 : i32 to index
    %c0_22 = arith.constant 0 : index
    %c0_23 = arith.constant 0 : index
    %32 = vector.load %arg12[%31, %c0_22, %c0_23] : memref<8x8x128xf32, #tpu.memory_space<vmem>>, vector<1x8x128xf32>
    %33 = vector.shape_cast %32 : vector<1x8x128xf32> to vector<8x128xf32>
    %cst_24 = arith.constant dense<0.000000e+00> : vector<8x128xf32>
    %34 = tpu.matmul %26, %1, %cst_24 {dimension_numbers = #tpu.dot_dimension_numbers<[1], [0], [0], [1], [0, 0, 1, 1], [], []>} : vector<8x128xf32>, vector<128x128xf32>, vector<8x128xf32> -> vector<8x128xf32>
    %35 = arith.addf %33, %34 : vector<8x128xf32>
    %36 = math.tanh %35 : vector<8x128xf32>
    %37 = arith.index_cast %c2_i32 : i32 to index
    %c0_25 = arith.constant 0 : index
    %c0_26 = arith.constant 0 : index
    %38 = vector.load %arg12[%37, %c0_25, %c0_26] : memref<8x8x128xf32, #tpu.memory_space<vmem>>, vector<1x8x128xf32>
    %39 = vector.shape_cast %38 : vector<1x8x128xf32> to vector<8x128xf32>
    %40 = vector.shape_cast %36 : vector<8x128xf32> to vector<1x8x128xf32>
    tpu.vector_store %arg12[%37, %c0_25, %c0_26], %40 {strides = array<i32>} : memref<8x8x128xf32, #tpu.memory_space<vmem>>, vector<1x8x128xf32>,
    %c3_i32 = arith.constant 3 : i32
    %41 = arith.index_cast %c3_i32 : i32 to index
    %c0_27 = arith.constant 0 : index
    %c0_28 = arith.constant 0 : index
    %42 = vector.load %arg12[%41, %c0_27, %c0_28] : memref<8x8x128xf32, #tpu.memory_space<vmem>>, vector<1x8x128xf32>
    %43 = vector.shape_cast %42 : vector<1x8x128xf32> to vector<8x128xf32>
    %cst_29 = arith.constant dense<0.000000e+00> : vector<8x128xf32>
    %44 = tpu.matmul %36, %1, %cst_29 {dimension_numbers = #tpu.dot_dimension_numbers<[1], [0], [0], [1], [0, 0, 1, 1], [], []>} : vector<8x128xf32>, vector<128x128xf32>, vector<8x128xf32> -> vector<8x128xf32>
    %45 = arith.addf %43, %44 : vector<8x128xf32>
    %46 = math.tanh %45 : vector<8x128xf32>
    %47 = arith.index_cast %c3_i32 : i32 to index
    %c0_30 = arith.constant 0 : index
    %c0_31 = arith.constant 0 : index
    %48 = vector.load %arg12[%47, %c0_30, %c0_31] : memref<8x8x128xf32, #tpu.memory_space<vmem>>, vector<1x8x128xf32>
    %49 = vector.shape_cast %48 : vector<1x8x128xf32> to vector<8x128xf32>
    %50 = vector.shape_cast %46 : vector<8x128xf32> to vector<1x8x128xf32>
    tpu.vector_store %arg12[%47, %c0_30, %c0_31], %50 {strides = array<i32>} : memref<8x8x128xf32, #tpu.memory_space<vmem>>, vector<1x8x128xf32>,
    %c4_i32 = arith.constant 4 : i32
    %51 = arith.index_cast %c4_i32 : i32 to index
    %c0_32 = arith.constant 0 : index
    %c0_33 = arith.constant 0 : index
    %52 = vector.load %arg12[%51, %c0_32, %c0_33] : memref<8x8x128xf32, #tpu.memory_space<vmem>>, vector<1x8x128xf32>
    %53 = vector.shape_cast %52 : vector<1x8x128xf32> to vector<8x128xf32>
    %cst_34 = arith.constant dense<0.000000e+00> : vector<8x128xf32>
    %54 = tpu.matmul %46, %1, %cst_34 {dimension_numbers = #tpu.dot_dimension_numbers<[1], [0], [0], [1], [0, 0, 1, 1], [], []>} : vector<8x128xf32>, vector<128x128xf32>, vector<8x128xf32> -> vector<8x128xf32>
    %55 = arith.addf %53, %54 : vector<8x128xf32>
    %56 = math.tanh %55 : vector<8x128xf32>
    %57 = arith.index_cast %c4_i32 : i32 to index
    %c0_35 = arith.constant 0 : index
    %c0_36 = arith.constant 0 : index
    %58 = vector.load %arg12[%57, %c0_35, %c0_36] : memref<8x8x128xf32, #tpu.memory_space<vmem>>, vector<1x8x128xf32>
    %59 = vector.shape_cast %58 : vector<1x8x128xf32> to vector<8x128xf32>
    %60 = vector.shape_cast %56 : vector<8x128xf32> to vector<1x8x128xf32>
    tpu.vector_store %arg12[%57, %c0_35, %c0_36], %60 {strides = array<i32>} : memref<8x8x128xf32, #tpu.memory_space<vmem>>, vector<1x8x128xf32>,
    %c5_i32 = arith.constant 5 : i32
    %61 = arith.index_cast %c5_i32 : i32 to index
    %c0_37 = arith.constant 0 : index
    %c0_38 = arith.constant 0 : index
    %62 = vector.load %arg12[%61, %c0_37, %c0_38] : memref<8x8x128xf32, #tpu.memory_space<vmem>>, vector<1x8x128xf32>
    %63 = vector.shape_cast %62 : vector<1x8x128xf32> to vector<8x128xf32>
    %cst_39 = arith.constant dense<0.000000e+00> : vector<8x128xf32>
    %64 = tpu.matmul %56, %1, %cst_39 {dimension_numbers = #tpu.dot_dimension_numbers<[1], [0], [0], [1], [0, 0, 1, 1], [], []>} : vector<8x128xf32>, vector<128x128xf32>, vector<8x128xf32> -> vector<8x128xf32>
    %65 = arith.addf %63, %64 : vector<8x128xf32>
    %66 = math.tanh %65 : vector<8x128xf32>
    %67 = arith.index_cast %c5_i32 : i32 to index
    %c0_40 = arith.constant 0 : index
    %c0_41 = arith.constant 0 : index
    %68 = vector.load %arg12[%67, %c0_40, %c0_41] : memref<8x8x128xf32, #tpu.memory_space<vmem>>, vector<1x8x128xf32>
    %69 = vector.shape_cast %68 : vector<1x8x128xf32> to vector<8x128xf32>
    %70 = vector.shape_cast %66 : vector<8x128xf32> to vector<1x8x128xf32>
    tpu.vector_store %arg12[%67, %c0_40, %c0_41], %70 {strides = array<i32>} : memref<8x8x128xf32, #tpu.memory_space<vmem>>, vector<1x8x128xf32>,
    %c6_i32 = arith.constant 6 : i32
    %71 = arith.index_cast %c6_i32 : i32 to index
    %c0_42 = arith.constant 0 : index
    %c0_43 = arith.constant 0 : index
    %72 = vector.load %arg12[%71, %c0_42, %c0_43] : memref<8x8x128xf32, #tpu.memory_space<vmem>>, vector<1x8x128xf32>
    %73 = vector.shape_cast %72 : vector<1x8x128xf32> to vector<8x128xf32>
    %cst_44 = arith.constant dense<0.000000e+00> : vector<8x128xf32>
    %74 = tpu.matmul %66, %1, %cst_44 {dimension_numbers = #tpu.dot_dimension_numbers<[1], [0], [0], [1], [0, 0, 1, 1], [], []>} : vector<8x128xf32>, vector<128x128xf32>, vector<8x128xf32> -> vector<8x128xf32>
    %75 = arith.addf %73, %74 : vector<8x128xf32>
    %76 = math.tanh %75 : vector<8x128xf32>
    %77 = arith.index_cast %c6_i32 : i32 to index
    %c0_45 = arith.constant 0 : index
    %c0_46 = arith.constant 0 : index
    %78 = vector.load %arg12[%77, %c0_45, %c0_46] : memref<8x8x128xf32, #tpu.memory_space<vmem>>, vector<1x8x128xf32>
    %79 = vector.shape_cast %78 : vector<1x8x128xf32> to vector<8x128xf32>
    %80 = vector.shape_cast %76 : vector<8x128xf32> to vector<1x8x128xf32>
    tpu.vector_store %arg12[%77, %c0_45, %c0_46], %80 {strides = array<i32>} : memref<8x8x128xf32, #tpu.memory_space<vmem>>, vector<1x8x128xf32>,
    %c7_i32 = arith.constant 7 : i32
    %81 = arith.index_cast %c7_i32 : i32 to index
    %c0_47 = arith.constant 0 : index
    %c0_48 = arith.constant 0 : index
    %82 = vector.load %arg12[%81, %c0_47, %c0_48] : memref<8x8x128xf32, #tpu.memory_space<vmem>>, vector<1x8x128xf32>
    %83 = vector.shape_cast %82 : vector<1x8x128xf32> to vector<8x128xf32>
    %cst_49 = arith.constant dense<0.000000e+00> : vector<8x128xf32>
    %84 = tpu.matmul %76, %1, %cst_49 {dimension_numbers = #tpu.dot_dimension_numbers<[1], [0], [0], [1], [0, 0, 1, 1], [], []>} : vector<8x128xf32>, vector<128x128xf32>, vector<8x128xf32> -> vector<8x128xf32>
    %85 = arith.addf %83, %84 : vector<8x128xf32>
    %86 = math.tanh %85 : vector<8x128xf32>
    %87 = arith.index_cast %c7_i32 : i32 to index
    %c0_50 = arith.constant 0 : index
    %c0_51 = arith.constant 0 : index
    %88 = vector.load %arg12[%87, %c0_50, %c0_51] : memref<8x8x128xf32, #tpu.memory_space<vmem>>, vector<1x8x128xf32>
    %89 = vector.shape_cast %88 : vector<1x8x128xf32> to vector<8x128xf32>
    %90 = vector.shape_cast %86 : vector<8x128xf32> to vector<1x8x128xf32>
    tpu.vector_store %arg12[%87, %c0_50, %c0_51], %90 {strides = array<i32>} : memref<8x8x128xf32, #tpu.memory_space<vmem>>, vector<1x8x128xf32>,
    %c8_i32 = arith.constant 8 : i32
    %c0_52 = arith.constant 0 : index
    %c0_53 = arith.constant 0 : index
    %c0_54 = arith.constant 0 : index
    %91 = vector.load %arg11[%c0_52, %c0_53, %c0_54] : memref<2x8x128xf32, #tpu.memory_space<vmem>>, vector<1x8x128xf32>
    %92 = vector.shape_cast %91 : vector<1x8x128xf32> to vector<8x128xf32>
    %93 = vector.shape_cast %86 : vector<8x128xf32> to vector<1x8x128xf32>
    tpu.vector_store %arg11[%c0_52, %c0_53, %c0_54], %93 {strides = array<i32>} : memref<2x8x128xf32, #tpu.memory_space<vmem>>, vector<1x8x128xf32>,
    %c0_55 = arith.constant 0 : index
    %c0_56 = arith.constant 0 : index
    %94 = vector.load %arg5[%c0_55, %c0_56] : memref<128x128xf32, #tpu.memory_space<vmem>>, vector<128x128xf32>
    %c0_57 = arith.constant 0 : index
    %c0_58 = arith.constant 0 : index
    %95 = vector.load %arg6[%c0_57, %c0_58] : memref<128x128xf32, #tpu.memory_space<vmem>>, vector<128x128xf32>
    %c0_59 = arith.constant 0 : index
    %c0_60 = arith.constant 0 : index
    %96 = vector.load %arg7[%c0_59, %c0_60] : memref<1x128xf32, #tpu.memory_space<vmem>>, vector<1x128xf32>
    %c0_61 = arith.constant 0 : index
    %c0_62 = arith.constant 0 : index
    %c0_63 = arith.constant 0 : index
    %97 = vector.load %arg12[%c0_61, %c0_62, %c0_63] : memref<8x8x128xf32, #tpu.memory_space<vmem>>, vector<8x8x128xf32>
    %98 = vector.shape_cast %97 : vector<8x8x128xf32> to vector<64x128xf32>
    %cst_64 = arith.constant dense<0.000000e+00> : vector<64x128xf32>
    %99 = tpu.matmul %98, %94, %cst_64 {dimension_numbers = #tpu.dot_dimension_numbers<[1], [0], [0], [1], [0, 0, 1, 1], [], []>} : vector<64x128xf32>, vector<128x128xf32>, vector<64x128xf32> -> vector<64x128xf32>
    %100 = vector.broadcast %96 : vector<1x128xf32> to vector<64x128xf32>
    %101 = arith.addf %99, %100 : vector<64x128xf32>
    %102 = vector.shape_cast %101 : vector<64x128xf32> to vector<8x8x128xf32>
    %c0_65 = arith.constant 0 : index
    %c0_66 = arith.constant 0 : index
    %c0_67 = arith.constant 0 : index
    %103 = vector.load %arg12[%c0_65, %c0_66, %c0_67] : memref<8x8x128xf32, #tpu.memory_space<vmem>>, vector<8x8x128xf32>
    tpu.vector_store %arg12[%c0_65, %c0_66, %c0_67], %102 {strides = array<i32>} : memref<8x8x128xf32, #tpu.memory_space<vmem>>, vector<8x8x128xf32>,
    %cst_68 = arith.constant 0.000000e+00 : f32
    %104 = vector.broadcast %cst_68 : f32 to vector<8x128xf32>
    %c0_i32_69 = arith.constant 0 : i32
    %105 = arith.index_cast %c0_i32_69 : i32 to index
    %c0_70 = arith.constant 0 : index
    %c0_71 = arith.constant 0 : index
    %106 = vector.load %arg12[%105, %c0_70, %c0_71] : memref<8x8x128xf32, #tpu.memory_space<vmem>>, vector<1x8x128xf32>
    %107 = vector.shape_cast %106 : vector<1x8x128xf32> to vector<8x128xf32>
    %cst_72 = arith.constant dense<0.000000e+00> : vector<8x128xf32>
    %108 = tpu.matmul %104, %95, %cst_72 {dimension_numbers = #tpu.dot_dimension_numbers<[1], [0], [0], [1], [0, 0, 1, 1], [], []>} : vector<8x128xf32>, vector<128x128xf32>, vector<8x128xf32> -> vector<8x128xf32>
    %109 = arith.addf %107, %108 : vector<8x128xf32>
    %110 = math.tanh %109 : vector<8x128xf32>
    %111 = arith.index_cast %c0_i32_69 : i32 to index
    %c0_73 = arith.constant 0 : index
    %c0_74 = arith.constant 0 : index
    %112 = vector.load %arg12[%111, %c0_73, %c0_74] : memref<8x8x128xf32, #tpu.memory_space<vmem>>, vector<1x8x128xf32>
    %113 = vector.shape_cast %112 : vector<1x8x128xf32> to vector<8x128xf32>
    %114 = vector.shape_cast %110 : vector<8x128xf32> to vector<1x8x128xf32>
    tpu.vector_store %arg12[%111, %c0_73, %c0_74], %114 {strides = array<i32>} : memref<8x8x128xf32, #tpu.memory_space<vmem>>, vector<1x8x128xf32>,
    %c1_i32_75 = arith.constant 1 : i32
    %115 = arith.index_cast %c1_i32_75 : i32 to index
    %c0_76 = arith.constant 0 : index
    %c0_77 = arith.constant 0 : index
    %116 = vector.load %arg12[%115, %c0_76, %c0_77] : memref<8x8x128xf32, #tpu.memory_space<vmem>>, vector<1x8x128xf32>
    %117 = vector.shape_cast %116 : vector<1x8x128xf32> to vector<8x128xf32>
    %cst_78 = arith.constant dense<0.000000e+00> : vector<8x128xf32>
    %118 = tpu.matmul %110, %95, %cst_78 {dimension_numbers = #tpu.dot_dimension_numbers<[1], [0], [0], [1], [0, 0, 1, 1], [], []>} : vector<8x128xf32>, vector<128x128xf32>, vector<8x128xf32> -> vector<8x128xf32>
    %119 = arith.addf %117, %118 : vector<8x128xf32>
    %120 = math.tanh %119 : vector<8x128xf32>
    %121 = arith.index_cast %c1_i32_75 : i32 to index
    %c0_79 = arith.constant 0 : index
    %c0_80 = arith.constant 0 : index
    %122 = vector.load %arg12[%121, %c0_79, %c0_80] : memref<8x8x128xf32, #tpu.memory_space<vmem>>, vector<1x8x128xf32>
    %123 = vector.shape_cast %122 : vector<1x8x128xf32> to vector<8x128xf32>
    %124 = vector.shape_cast %120 : vector<8x128xf32> to vector<1x8x128xf32>
    tpu.vector_store %arg12[%121, %c0_79, %c0_80], %124 {strides = array<i32>} : memref<8x8x128xf32, #tpu.memory_space<vmem>>, vector<1x8x128xf32>,
    %c2_i32_81 = arith.constant 2 : i32
    %125 = arith.index_cast %c2_i32_81 : i32 to index
    %c0_82 = arith.constant 0 : index
    %c0_83 = arith.constant 0 : index
    %126 = vector.load %arg12[%125, %c0_82, %c0_83] : memref<8x8x128xf32, #tpu.memory_space<vmem>>, vector<1x8x128xf32>
    %127 = vector.shape_cast %126 : vector<1x8x128xf32> to vector<8x128xf32>
    %cst_84 = arith.constant dense<0.000000e+00> : vector<8x128xf32>
    %128 = tpu.matmul %120, %95, %cst_84 {dimension_numbers = #tpu.dot_dimension_numbers<[1], [0], [0], [1], [0, 0, 1, 1], [], []>} : vector<8x128xf32>, vector<128x128xf32>, vector<8x128xf32> -> vector<8x128xf32>
    %129 = arith.addf %127, %128 : vector<8x128xf32>
    %130 = math.tanh %129 : vector<8x128xf32>
    %131 = arith.index_cast %c2_i32_81 : i32 to index
    %c0_85 = arith.constant 0 : index
    %c0_86 = arith.constant 0 : index
    %132 = vector.load %arg12[%131, %c0_85, %c0_86] : memref<8x8x128xf32, #tpu.memory_space<vmem>>, vector<1x8x128xf32>
    %133 = vector.shape_cast %132 : vector<1x8x128xf32> to vector<8x128xf32>
    %134 = vector.shape_cast %130 : vector<8x128xf32> to vector<1x8x128xf32>
    tpu.vector_store %arg12[%131, %c0_85, %c0_86], %134 {strides = array<i32>} : memref<8x8x128xf32, #tpu.memory_space<vmem>>, vector<1x8x128xf32>,
    %c3_i32_87 = arith.constant 3 : i32
    %135 = arith.index_cast %c3_i32_87 : i32 to index
    %c0_88 = arith.constant 0 : index
    %c0_89 = arith.constant 0 : index
    %136 = vector.load %arg12[%135, %c0_88, %c0_89] : memref<8x8x128xf32, #tpu.memory_space<vmem>>, vector<1x8x128xf32>
    %137 = vector.shape_cast %136 : vector<1x8x128xf32> to vector<8x128xf32>
    %cst_90 = arith.constant dense<0.000000e+00> : vector<8x128xf32>
    %138 = tpu.matmul %130, %95, %cst_90 {dimension_numbers = #tpu.dot_dimension_numbers<[1], [0], [0], [1], [0, 0, 1, 1], [], []>} : vector<8x128xf32>, vector<128x128xf32>, vector<8x128xf32> -> vector<8x128xf32>
    %139 = arith.addf %137, %138 : vector<8x128xf32>
    %140 = math.tanh %139 : vector<8x128xf32>
    %141 = arith.index_cast %c3_i32_87 : i32 to index
    %c0_91 = arith.constant 0 : index
    %c0_92 = arith.constant 0 : index
    %142 = vector.load %arg12[%141, %c0_91, %c0_92] : memref<8x8x128xf32, #tpu.memory_space<vmem>>, vector<1x8x128xf32>
    %143 = vector.shape_cast %142 : vector<1x8x128xf32> to vector<8x128xf32>
    %144 = vector.shape_cast %140 : vector<8x128xf32> to vector<1x8x128xf32>
    tpu.vector_store %arg12[%141, %c0_91, %c0_92], %144 {strides = array<i32>} : memref<8x8x128xf32, #tpu.memory_space<vmem>>, vector<1x8x128xf32>,
    %c4_i32_93 = arith.constant 4 : i32
    %145 = arith.index_cast %c4_i32_93 : i32 to index
    %c0_94 = arith.constant 0 : index
    %c0_95 = arith.constant 0 : index
    %146 = vector.load %arg12[%145, %c0_94, %c0_95] : memref<8x8x128xf32, #tpu.memory_space<vmem>>, vector<1x8x128xf32>
    %147 = vector.shape_cast %146 : vector<1x8x128xf32> to vector<8x128xf32>
    %cst_96 = arith.constant dense<0.000000e+00> : vector<8x128xf32>
    %148 = tpu.matmul %140, %95, %cst_96 {dimension_numbers = #tpu.dot_dimension_numbers<[1], [0], [0], [1], [0, 0, 1, 1], [], []>} : vector<8x128xf32>, vector<128x128xf32>, vector<8x128xf32> -> vector<8x128xf32>
    %149 = arith.addf %147, %148 : vector<8x128xf32>
    %150 = math.tanh %149 : vector<8x128xf32>
    %151 = arith.index_cast %c4_i32_93 : i32 to index
    %c0_97 = arith.constant 0 : index
    %c0_98 = arith.constant 0 : index
    %152 = vector.load %arg12[%151, %c0_97, %c0_98] : memref<8x8x128xf32, #tpu.memory_space<vmem>>, vector<1x8x128xf32>
    %153 = vector.shape_cast %152 : vector<1x8x128xf32> to vector<8x128xf32>
    %154 = vector.shape_cast %150 : vector<8x128xf32> to vector<1x8x128xf32>
    tpu.vector_store %arg12[%151, %c0_97, %c0_98], %154 {strides = array<i32>} : memref<8x8x128xf32, #tpu.memory_space<vmem>>, vector<1x8x128xf32>,
    %c5_i32_99 = arith.constant 5 : i32
    %155 = arith.index_cast %c5_i32_99 : i32 to index
    %c0_100 = arith.constant 0 : index
    %c0_101 = arith.constant 0 : index
    %156 = vector.load %arg12[%155, %c0_100, %c0_101] : memref<8x8x128xf32, #tpu.memory_space<vmem>>, vector<1x8x128xf32>
    %157 = vector.shape_cast %156 : vector<1x8x128xf32> to vector<8x128xf32>
    %cst_102 = arith.constant dense<0.000000e+00> : vector<8x128xf32>
    %158 = tpu.matmul %150, %95, %cst_102 {dimension_numbers = #tpu.dot_dimension_numbers<[1], [0], [0], [1], [0, 0, 1, 1], [], []>} : vector<8x128xf32>, vector<128x128xf32>, vector<8x128xf32> -> vector<8x128xf32>
    %159 = arith.addf %157, %158 : vector<8x128xf32>
    %160 = math.tanh %159 : vector<8x128xf32>
    %161 = arith.index_cast %c5_i32_99 : i32 to index
    %c0_103 = arith.constant 0 : index
    %c0_104 = arith.constant 0 : index
    %162 = vector.load %arg12[%161, %c0_103, %c0_104] : memref<8x8x128xf32, #tpu.memory_space<vmem>>, vector<1x8x128xf32>
    %163 = vector.shape_cast %162 : vector<1x8x128xf32> to vector<8x128xf32>
    %164 = vector.shape_cast %160 : vector<8x128xf32> to vector<1x8x128xf32>
    tpu.vector_store %arg12[%161, %c0_103, %c0_104], %164 {strides = array<i32>} : memref<8x8x128xf32, #tpu.memory_space<vmem>>, vector<1x8x128xf32>,
    %c6_i32_105 = arith.constant 6 : i32
    %165 = arith.index_cast %c6_i32_105 : i32 to index
    %c0_106 = arith.constant 0 : index
    %c0_107 = arith.constant 0 : index
    %166 = vector.load %arg12[%165, %c0_106, %c0_107] : memref<8x8x128xf32, #tpu.memory_space<vmem>>, vector<1x8x128xf32>
    %167 = vector.shape_cast %166 : vector<1x8x128xf32> to vector<8x128xf32>
    %cst_108 = arith.constant dense<0.000000e+00> : vector<8x128xf32>
    %168 = tpu.matmul %160, %95, %cst_108 {dimension_numbers = #tpu.dot_dimension_numbers<[1], [0], [0], [1], [0, 0, 1, 1], [], []>} : vector<8x128xf32>, vector<128x128xf32>, vector<8x128xf32> -> vector<8x128xf32>
    %169 = arith.addf %167, %168 : vector<8x128xf32>
    %170 = math.tanh %169 : vector<8x128xf32>
    %171 = arith.index_cast %c6_i32_105 : i32 to index
    %c0_109 = arith.constant 0 : index
    %c0_110 = arith.constant 0 : index
    %172 = vector.load %arg12[%171, %c0_109, %c0_110] : memref<8x8x128xf32, #tpu.memory_space<vmem>>, vector<1x8x128xf32>
    %173 = vector.shape_cast %172 : vector<1x8x128xf32> to vector<8x128xf32>
    %174 = vector.shape_cast %170 : vector<8x128xf32> to vector<1x8x128xf32>
    tpu.vector_store %arg12[%171, %c0_109, %c0_110], %174 {strides = array<i32>} : memref<8x8x128xf32, #tpu.memory_space<vmem>>, vector<1x8x128xf32>,
    %c7_i32_111 = arith.constant 7 : i32
    %175 = arith.index_cast %c7_i32_111 : i32 to index
    %c0_112 = arith.constant 0 : index
    %c0_113 = arith.constant 0 : index
    %176 = vector.load %arg12[%175, %c0_112, %c0_113] : memref<8x8x128xf32, #tpu.memory_space<vmem>>, vector<1x8x128xf32>
    %177 = vector.shape_cast %176 : vector<1x8x128xf32> to vector<8x128xf32>
    %cst_114 = arith.constant dense<0.000000e+00> : vector<8x128xf32>
    %178 = tpu.matmul %170, %95, %cst_114 {dimension_numbers = #tpu.dot_dimension_numbers<[1], [0], [0], [1], [0, 0, 1, 1], [], []>} : vector<8x128xf32>, vector<128x128xf32>, vector<8x128xf32> -> vector<8x128xf32>
    %179 = arith.addf %177, %178 : vector<8x128xf32>
    %180 = math.tanh %179 : vector<8x128xf32>
    %181 = arith.index_cast %c7_i32_111 : i32 to index
    %c0_115 = arith.constant 0 : index
    %c0_116 = arith.constant 0 : index
    %182 = vector.load %arg12[%181, %c0_115, %c0_116] : memref<8x8x128xf32, #tpu.memory_space<vmem>>, vector<1x8x128xf32>
    %183 = vector.shape_cast %182 : vector<1x8x128xf32> to vector<8x128xf32>
    %184 = vector.shape_cast %180 : vector<8x128xf32> to vector<1x8x128xf32>
    tpu.vector_store %arg12[%181, %c0_115, %c0_116], %184 {strides = array<i32>} : memref<8x8x128xf32, #tpu.memory_space<vmem>>, vector<1x8x128xf32>,
    %c8_i32_117 = arith.constant 8 : i32
    %c1 = arith.constant 1 : index
    %c0_118 = arith.constant 0 : index
    %c0_119 = arith.constant 0 : index
    %185 = vector.load %arg11[%c1, %c0_118, %c0_119] : memref<2x8x128xf32, #tpu.memory_space<vmem>>, vector<1x8x128xf32>
    %186 = vector.shape_cast %185 : vector<1x8x128xf32> to vector<8x128xf32>
    %187 = vector.shape_cast %180 : vector<8x128xf32> to vector<1x8x128xf32>
    tpu.vector_store %arg11[%c1, %c0_118, %c0_119], %187 {strides = array<i32>} : memref<2x8x128xf32, #tpu.memory_space<vmem>>, vector<1x8x128xf32>,
    %c0_120 = arith.constant 0 : index
    %c0_121 = arith.constant 0 : index
    %188 = vector.load %arg8[%c0_120, %c0_121] : memref<128x128xf32, #tpu.memory_space<vmem>>, vector<128x128xf32>
    %c0_122 = arith.constant 0 : index
    %c0_123 = arith.constant 0 : index
    %189 = vector.load %arg9[%c0_122, %c0_123] : memref<1x128xf32, #tpu.memory_space<vmem>>, vector<1x128xf32>
    %c0_124 = arith.constant 0 : index
    %c0_125 = arith.constant 0 : index
    %c0_126 = arith.constant 0 : index
    %190 = vector.load %arg12[%c0_124, %c0_125, %c0_126] : memref<8x8x128xf32, #tpu.memory_space<vmem>>, vector<8x8x128xf32>
    %191 = vector.shape_cast %190 : vector<8x8x128xf32> to vector<64x128xf32>
    %cst_127 = arith.constant dense<0.000000e+00> : vector<64x128xf32>
    %192 = tpu.matmul %191, %188, %cst_127 {dimension_numbers = #tpu.dot_dimension_numbers<[1], [0], [0], [1], [0, 0, 1, 1], [], []>} : vector<64x128xf32>, vector<128x128xf32>, vector<64x128xf32> -> vector<64x128xf32>
    %193 = vector.broadcast %189 : vector<1x128xf32> to vector<64x128xf32>
    %194 = arith.addf %192, %193 : vector<64x128xf32>
    %195 = vector.shape_cast %194 : vector<64x128xf32> to vector<8x8x128xf32>
    %c0_128 = arith.constant 0 : index
    %c0_129 = arith.constant 0 : index
    %c0_130 = arith.constant 0 : index
    %196 = vector.load %arg10[%c0_128, %c0_129, %c0_130] : memref<8x8x128xf32, #tpu.memory_space<vmem>>, vector<8x8x128xf32>
    tpu.vector_store %arg10[%c0_128, %c0_129, %c0_130], %195 {strides = array<i32>} : memref<8x8x128xf32, #tpu.memory_space<vmem>>, vector<8x8x128xf32>,
    return
  }
  func.func @transform_0(%arg0: i32) -> (i32, i32, i32) {
    %c0_i32 = arith.constant 0 : i32
    %c0_i32_0 = arith.constant 0 : i32
    %c0_i32_1 = arith.constant 0 : i32
    return %c0_i32, %arg0, %c0_i32_0 : i32, i32, i32
  }
  func.func @transform_1(%arg0: i32) -> (i32, i32) {
    %c0_i32 = arith.constant 0 : i32
    %c0_i32_0 = arith.constant 0 : i32
    %c0_i32_1 = arith.constant 0 : i32
    return %c0_i32, %c0_i32_0 : i32, i32
  }
  func.func @transform_2(%arg0: i32) -> (i32, i32) {
    %c0_i32 = arith.constant 0 : i32
    %c0_i32_0 = arith.constant 0 : i32
    %c0_i32_1 = arith.constant 0 : i32
    return %c0_i32, %c0_i32_0 : i32, i32
  }
  func.func @transform_3(%arg0: i32) -> (i32, i32) {
    %c0_i32 = arith.constant 0 : i32
    %c0_i32_0 = arith.constant 0 : i32
    %c0_i32_1 = arith.constant 0 : i32
    return %c0_i32, %c0_i32_0 : i32, i32
  }
  func.func @transform_4(%arg0: i32) -> (i32, i32) {
    %c0_i32 = arith.constant 0 : i32
    %c0_i32_0 = arith.constant 0 : i32
    %c0_i32_1 = arith.constant 0 : i32
    return %c0_i32, %c0_i32_0 : i32, i32
  }
  func.func @transform_5(%arg0: i32) -> (i32, i32) {
    %c0_i32 = arith.constant 0 : i32
    %c0_i32_0 = arith.constant 0 : i32
    %c0_i32_1 = arith.constant 0 : i32
    return %c0_i32, %c0_i32_0 : i32, i32
  }
  func.func @transform_6(%arg0: i32) -> (i32, i32) {
    %c0_i32 = arith.constant 0 : i32
    %c0_i32_0 = arith.constant 0 : i32
    %c0_i32_1 = arith.constant 0 : i32
    return %c0_i32, %c0_i32_0 : i32, i32
  }
  func.func @transform_7(%arg0: i32) -> (i32, i32) {
    %c0_i32 = arith.constant 0 : i32
    %c0_i32_0 = arith.constant 0 : i32
    %c0_i32_1 = arith.constant 0 : i32
    return %c0_i32, %c0_i32_0 : i32, i32
  }
  func.func @transform_8(%arg0: i32) -> (i32, i32) {
    %c0_i32 = arith.constant 0 : i32
    %c0_i32_0 = arith.constant 0 : i32
    %c0_i32_1 = arith.constant 0 : i32
    return %c0_i32, %c0_i32_0 : i32, i32
  }
  func.func @transform_9(%arg0: i32) -> (i32, i32, i32) {
    %c0_i32 = arith.constant 0 : i32
    %c0_i32_0 = arith.constant 0 : i32
    %c0_i32_1 = arith.constant 0 : i32
    return %c0_i32, %arg0, %c0_i32_0 : i32, i32, i32
  }
  func.func @transform_10(%arg0: i32) -> (i32, i32, i32) {
    %c0_i32 = arith.constant 0 : i32
    %c0_i32_0 = arith.constant 0 : i32
    %c0_i32_1 = arith.constant 0 : i32
    return %c0_i32, %arg0, %c0_i32_0 : i32, i32, i32
  }
}

</mosaic_0001>

<bundles_post_ra>
// kernel: tpu_custom_call.1
= control target key start
LH: loop header
LB: loop body
LE: loop exit
PB: predicated region body
PF: predicated region fallthrough
CT: control target
= control target key end

     0   :  { %16 = vsyncpa [#allocation4], 0  ;;  %s4296_s0 = inlined_call_operand.hbm [shape: f32[8,8,32], index: 0, kind: input, shape index: {}]   ;;  %s4297_s1 = inlined_call_operand.hbm [shape: f32[32,128], index: 1, kind: input, shape index: {}]   ;;  %s4298_s2 = inlined_call_operand.hbm [shape: f32[128,128], index: 2, kind: input, shape index: {}]   ;;  %s4299_s3 = inlined_call_operand.hbm [shape: f32[1,128], index: 3, kind: input, shape index: {}]   ;;  %s4300_s4 = inlined_call_operand.hbm [shape: f32[128,128], index: 4, kind: input, shape index: {}]   ;;  %s4301_s5 = inlined_call_operand.hbm [shape: f32[128,128], index: 5, kind: input, shape index: {}]   ;;  %s4302_s6 = inlined_call_operand.hbm [shape: f32[1,128], index: 6, kind: input, shape index: {}]   ;;  %s4303_s7 = inlined_call_operand.hbm [shape: f32[128,128], index: 7, kind: input, shape index: {}]   ;;  %s4304_s8 = inlined_call_operand.hbm [shape: f32[1,128], index: 8, kind: input, shape index: {}]   ;;  %s4305_s9 = inlined_call_operand.hbm [shape: f32[8,8,128], index: 9, kind: output, shape index: {0}]   ;;  %s4306_s10 = inlined_call_operand.hbm [shape: f32[2,8,128], index: 10, kind: output, shape index: {1}]  }
   0x1   :  { %17 = vsyncpa [#allocation7], 0 }
   0x2   :  { %18 = vsyncpa [#allocation10], 0 }
   0x3   :  { %19 = vsyncpa [#allocation13], 0 }
   0x4   :  { %20 = vsyncpa [#allocation16], 0 }
   0x5   :  { %21 = vsyncpa [#allocation5], 0 }
   0x6   :  { %22 = vsyncpa [#allocation20], 0  ;;  %s3631_s13 = smov [#allocation6]   ;;  %s3632_s15 = smov [#allocation9]  }
   0x7   :  { %s40_s14 = sshll.u32 %s3631_s13, 4  ;;  %s65_s16 = sshll.u32 %s3632_s15, 4  ;;  %s41_s14 = int_to_ptr.vmem [resolvable:$true] %s40_s14  ;;  %s3702_s16 = int_to_ptr.vmem [resolvable:$true] %s65_s16 }
   0x8   :  { %s3375_s19 = scalar_lea.hbm %s4297_s1, 512 }
   0x9   :  { %p3376_p0 = scmp.ne.s32.totalorder %s4297_s1, %s3375_s19  ;;  %p3379_p1 = scmp.lt.u32.totalorder %s3375_s19, %s4297_s1 }
   0xb   :  { %p3381_p2 = pnand %p3379_p1, %p3376_p0 }
   0xd   :  { %3384 = shalt.err (!%p3381_p2)
}
   0xe   :  { %s3385_s24 = scalar_lea.vmem %s41_s14, 512  ;;  %p3390_p4 = scmp.lt.s32.totalorder %s41_s14, %s41_s14 }
   0xf   :  { %p3386_p3 = scmp.ne.s32.totalorder %s41_s14, %s3385_s24  ;;  %p3391_p5 = scmp.lt.s32.totalorder %s3385_s24, %s3385_s24 }
  0x11   :  { %p3392_p6 = por %p3391_p5, %p3390_p4 }
  0x13   :  { %p3393_p7 = pnand %p3392_p6, %p3386_p3 }
  0x15   :  { %3396 = shalt.err (!%p3393_p7)
}
  0x16   :  { %s3633_s25 = smov 128   ;;  %s3634_s26 = smov 8  }
  0x17   :  { %46 = dma.hbm_to_vmem [thread:$0]  %s4297_s1, 512, %s41_s14, [#allocation7], %s3633_s25, %s3633_s25, %s3634_s26  }
  0x18   :  { %s3397_s11 = scalar_lea.hbm %s4299_s3, 16 }
  0x19   :  { %p3398_p8 = scmp.ne.s32.totalorder %s4299_s3, %s3397_s11  ;;  %p3401_p9 = scmp.lt.u32.totalorder %s3397_s11, %s4299_s3 }
  0x1b   :  { %p3403_p10 = pnand %p3401_p9, %p3398_p8 }
  0x1d   :  { %3406 = shalt.err (!%p3403_p10)
}
  0x1e   :  { %s3407_s18 = scalar_lea.vmem %s3702_s16, 16  ;;  %s3411_s1 = scalar_lea.vmem %s3702_s16, 32 }
  0x1f   :  { %p3408_p11 = scmp.ne.s32.totalorder %s3702_s16, %s3407_s18  ;;  %p3412_p12 = scmp.lt.s32.totalorder %s3702_s16, %s3702_s16 }
  0x20   :  { %p3413_p13 = scmp.lt.s32.totalorder %s3411_s1, %s3407_s18 }
  0x22   :  { %p3414_p0 = por %p3413_p13, %p3412_p12 }
  0x24   :  { %p3415_p1 = pnand %p3414_p0, %p3408_p11 }
  0x26   :  { %3418 = shalt.err (!%p3415_p1)
}
  0x27   :  { %68 = dma.hbm_to_vmem [thread:$0]  %s4299_s3, 16, %s3702_s16, [#allocation10]  }
  0x28   :  { %s3635_s20 = smov [#allocation12]   ;;  %s3636_s22 = smov [#allocation15]  }
  0x29   :  { %s86_s21 = sshll.u32 %s3635_s20, 4  ;;  %s108_s23 = sshll.u32 %s3636_s22, 4  ;;  %s87_s21 = int_to_ptr.vmem [resolvable:$true] %s86_s21  ;;  %s3737_s23 = int_to_ptr.vmem [resolvable:$true] %s108_s23 }
  0x2a   :  { %s3419_s28 = scalar_lea.hbm %s4301_s5, 2048 }
  0x2b   :  { %p3420_p2 = scmp.ne.s32.totalorder %s4301_s5, %s3419_s28  ;;  %p3423_p3 = scmp.lt.u32.totalorder %s3419_s28, %s4301_s5 }
  0x2d   :  { %p3425_p4 = pnand %p3423_p3, %p3420_p2 }
  0x2f   :  { %3428 = shalt.err (!%p3425_p4)
}
  0x30   :  { %s3429_s3 = scalar_lea.vmem %s87_s21, 2048  ;;  %p3434_p6 = scmp.lt.s32.totalorder %s87_s21, %s87_s21 }
  0x31   :  { %p3430_p5 = scmp.ne.s32.totalorder %s87_s21, %s3429_s3  ;;  %p3435_p7 = scmp.lt.s32.totalorder %s3429_s3, %s3429_s3 }
  0x33   :  { %p3436_p8 = por %p3435_p7, %p3434_p6 }
  0x35   :  { %p3437_p9 = pnand %p3436_p8, %p3430_p5 }
  0x37   :  { %3440 = shalt.err (!%p3437_p9)
}
  0x38   :  { %92 = dma.hbm_to_vmem [thread:$0]  %s4301_s5, 2048, %s87_s21, [#allocation13], %s3633_s25, %s3633_s25, %s3634_s26  }
  0x39   :  { %s3441_s18 = scalar_lea.hbm %s4303_s7, 2048 }
  0x3a   :  { %p3442_p10 = scmp.ne.s32.totalorder %s4303_s7, %s3441_s18  ;;  %p3445_p11 = scmp.lt.u32.totalorder %s3441_s18, %s4303_s7 }
  0x3c   :  { %p3447_p12 = pnand %p3445_p11, %p3442_p10 }
  0x3e   :  { %3450 = shalt.err (!%p3447_p12)
}
  0x3f   :  { %s3451_s22 = scalar_lea.vmem %s3737_s23, 2048  ;;  %p3456_p0 = scmp.lt.s32.totalorder %s3737_s23, %s3737_s23 }
  0x40   :  { %p3452_p13 = scmp.ne.s32.totalorder %s3737_s23, %s3451_s22  ;;  %p3457_p1 = scmp.lt.s32.totalorder %s3451_s22, %s3451_s22 }
  0x42   :  { %p3458_p2 = por %p3457_p1, %p3456_p0 }
  0x44   :  { %p3459_p3 = pnand %p3458_p2, %p3452_p13 }
  0x46   :  { %3462 = shalt.err (!%p3459_p3)
}
  0x47   :  { %114 = dma.hbm_to_vmem [thread:$0]  %s4303_s7, 2048, %s3737_s23, [#allocation16], %s3633_s25, %s3633_s25, %s3634_s26  }
  0x48   :  { %s3637_s24 = smov [#allocation3]   ;;  %s3638_s28 = smov [#allocation8]  }
  0x49   :  { %s28_s27 = sshll.u32 %s3637_s24, 4  ;;  %s52_s29 = sshll.u32 %s3638_s28, 4  ;;  %s29_s27 = int_to_ptr.vmem [resolvable:$true] %s28_s27  ;;  %s3774_s29 = int_to_ptr.vmem [resolvable:$true] %s52_s29 }
  0x4a   :  { %s3463_s12 = scalar_lea.hbm %s4296_s0, 1024 }
  0x4b   :  { %p3464_p4 = scmp.ne.s32.totalorder %s4296_s0, %s3463_s12  ;;  %p3467_p5 = scmp.lt.u32.totalorder %s3463_s12, %s4296_s0 }
  0x4d   :  { %p3469_p6 = pnand %p3467_p5, %p3464_p4 }
  0x4f   :  { %3472 = shalt.err (!%p3469_p6)
}
  0x50   :  { %s3473_s7 = scalar_lea.vmem %s29_s27, 1024  ;;  %p3478_p8 = scmp.lt.s32.totalorder %s29_s27, %s29_s27 }
  0x51   :  { %p3474_p7 = scmp.ne.s32.totalorder %s29_s27, %s3473_s7  ;;  %p3479_p9 = scmp.lt.s32.totalorder %s3473_s7, %s3473_s7 }
  0x53   :  { %p3480_p10 = por %p3479_p9, %p3478_p8 }
  0x55   :  { %p3481_p11 = pnand %p3480_p10, %p3474_p7 }
  0x57   :  { %3484 = shalt.err (!%p3481_p11)
}
  0x58   :  { %34 = dma.hbm_to_vmem [thread:$0]  %s4296_s0, 1024, %s29_s27, [#allocation4], %s3633_s25, %s3633_s25, %s3634_s26  }
  0x59   :  { %s3485_s14 = scalar_lea.hbm %s4298_s2, 2048 }
  0x5a   :  { %p3486_p12 = scmp.ne.s32.totalorder %s4298_s2, %s3485_s14  ;;  %p3489_p13 = scmp.lt.u32.totalorder %s3485_s14, %s4298_s2 }
  0x5c   :  { %p3491_p0 = pnand %p3489_p13, %p3486_p12 }
  0x5e   :  { %3494 = shalt.err (!%p3491_p0)
}
  0x5f   :  { %s3495_s21 = scalar_lea.vmem %s3774_s29, 2048  ;;  %p3500_p2 = scmp.lt.s32.totalorder %s3774_s29, %s3774_s29 }
  0x60   :  { %p3496_p1 = scmp.ne.s32.totalorder %s3774_s29, %s3495_s21  ;;  %p3501_p3 = scmp.lt.s32.totalorder %s3495_s21, %s3495_s21 }
  0x62   :  { %p3502_p4 = por %p3501_p3, %p3500_p2 }
  0x64   :  { %p3503_p5 = pnand %p3502_p4, %p3496_p1 }
  0x66   :  { %3506 = shalt.err (!%p3503_p5)
}
  0x67   :  { %58 = dma.hbm_to_vmem [thread:$0]  %s4298_s2, 2048, %s3774_s29, [#allocation7], %s3633_s25, %s3633_s25, %s3634_s26  }
  0x68   :  { %s3639_s27 = smov [#allocation11]   ;;  %s3640_s30 = smov [#allocation14]  }
  0x69   :  { %s74_s28 = sshll.u32 %s3639_s27, 4  ;;  %s99_s11 = sshll.u32 %s3640_s30, 4  ;;  %s75_s28 = int_to_ptr.vmem [resolvable:$true] %s74_s28  ;;  %s100_s11 = int_to_ptr.vmem [resolvable:$true] %s99_s11 }
  0x6a   :  { %s3507_s16 = scalar_lea.hbm %s4300_s4, 2048 }
  0x6b   :  { %p3508_p6 = scmp.ne.s32.totalorder %s4300_s4, %s3507_s16  ;;  %p3511_p7 = scmp.lt.u32.totalorder %s3507_s16, %s4300_s4 }
  0x6d   :  { %p3513_p8 = pnand %p3511_p7, %p3508_p6 }
  0x6f   :  { %3516 = shalt.err (!%p3513_p8)
}
  0x70   :  { %s3517_s2 = scalar_lea.vmem %s75_s28, 2048  ;;  %p3522_p10 = scmp.lt.s32.totalorder %s75_s28, %s75_s28 }
  0x71   :  { %p3518_p9 = scmp.ne.s32.totalorder %s75_s28, %s3517_s2  ;;  %p3523_p11 = scmp.lt.s32.totalorder %s3517_s2, %s3517_s2 }
  0x73   :  { %p3524_p12 = por %p3523_p11, %p3522_p10 }
  0x75   :  { %p3525_p13 = pnand %p3524_p12, %p3518_p9 }
  0x77   :  { %3528 = shalt.err (!%p3525_p13)
}
  0x78   :  { %80 = dma.hbm_to_vmem [thread:$0]  %s4300_s4, 2048, %s75_s28, [#allocation10], %s3633_s25, %s3633_s25, %s3634_s26  }
  0x79   :  { %s3529_s14 = scalar_lea.hbm %s4302_s6, 16 }
  0x7a   :  { %p3530_p0 = scmp.ne.s32.totalorder %s4302_s6, %s3529_s14  ;;  %p3533_p1 = scmp.lt.u32.totalorder %s3529_s14, %s4302_s6 }
  0x7c   :  { %p3535_p2 = pnand %p3533_p1, %p3530_p0 }
  0x7e   :  { %3538 = shalt.err (!%p3535_p2)
}
  0x7f   :  { %s3539_s21 = scalar_lea.vmem %s100_s11, 16  ;;  %s3543_s0 = scalar_lea.vmem %s100_s11, 32 }
  0x80   :  { %p3540_p3 = scmp.ne.s32.totalorder %s100_s11, %s3539_s21  ;;  %p3544_p4 = scmp.lt.s32.totalorder %s100_s11, %s100_s11 }
  0x81   :  { %p3545_p5 = scmp.lt.s32.totalorder %s3543_s0, %s3539_s21 }
  0x83   :  { %p3546_p6 = por %p3545_p5, %p3544_p4 }
  0x85   :  { %p3547_p7 = pnand %p3546_p6, %p3540_p3 }
  0x87   :  { %3550 = shalt.err (!%p3547_p7)
}
  0x88   :  { %102 = dma.hbm_to_vmem [thread:$0]  %s4302_s6, 16, %s100_s11, [#allocation13]  }
  0x89   :  { %s3641_s27 = smov [#allocation17]   ;;  %s3551_s3 = scalar_lea.hbm %s4304_s8, 16 }
  0x8a   :  { %s121_s28 = sshll.u32 %s3641_s27, 4  ;;  %p3552_p8 = scmp.ne.s32.totalorder %s4304_s8, %s3551_s3  ;;  %s122_s28 = int_to_ptr.vmem [resolvable:$true] %s121_s28 }
  0x8b   :  { %p3555_p9 = scmp.lt.u32.totalorder %s3551_s3, %s4304_s8 }
  0x8d   :  { %p3557_p10 = pnand %p3555_p9, %p3552_p8 }
  0x8f   :  { %3560 = shalt.err (!%p3557_p10)
}
  0x90   :  { %s3561_s23 = scalar_lea.vmem %s122_s28, 16  ;;  %s3565_s6 = scalar_lea.vmem %s122_s28, 32 }
  0x91   :  { %p3562_p11 = scmp.ne.s32.totalorder %s122_s28, %s3561_s23  ;;  %p3566_p12 = scmp.lt.s32.totalorder %s122_s28, %s122_s28 }
  0x92   :  { %p3567_p13 = scmp.lt.s32.totalorder %s3565_s6, %s3561_s23 }
  0x94   :  { %p3568_p0 = por %p3567_p13, %p3566_p12 }
  0x96   :  { %p3569_p1 = pnand %p3568_p0, %p3562_p11 }
  0x98   :  { %3572 = shalt.err (!%p3569_p1)
}
  0x99   :  { %124 = dma.hbm_to_vmem [thread:$0]  %s4304_s8, 16, %s122_s28, [#allocation16]  }
  0x9a   :  { %3617 = dma.done.wait [#allocation4], 1024  }
  0x9b   :  { %3618 = vsyncadd [#allocation4], 4294966272 }
  0x9c   :  { %3619 = dma.done.wait [#allocation7], 2560  }
  0x9d   :  { %3620 = vsyncadd [#allocation7], 4294964736 }
  0x9e   :  { %3621 = dma.done.wait [#allocation10], 2064  }
  0x9f   :  { %3622 = vsyncadd [#allocation10], 4294965232 }
  0xa0   :  { %3623 = dma.done.wait [#allocation13], 2064  }
  0xa1   :  { %3624 = vsyncadd [#allocation13], 4294965232 }
  0xa2   :  { %3625 = dma.done.wait [#allocation16], 2064  }
  0xa3   :  { %3626 = vsyncadd [#allocation16], 4294965232  ;;  %v3642_v0 = vmov 0.0|0.0   ;;  %vm3643_vm0 = vmmov 0   ;;  %v3644_v1 = vmov 0.0   ;;  %vm187_vm1 = vcmask 261120  }
  0xa4   :  { %2903 = vmatprep.subr.bf16.mxu0 %v3642_v0  ;;  %2290 = vmatprep.mubr.msk.f32.mxu0 %vm3643_vm0, %v3644_v1  ;;  %v152_v2 = vld [vmem:[#allocation6] sm:$0xff]  ;;  %v153_v3 = vld [vmem:[#allocation6 + $0x8] sm:$0xff]  ;;  %v154_v4 = vld [vmem:[#allocation6 + $0x10] sm:$0xff]  ;;  %s3645_s8 = smov [#allocation19]  }
  0xa5   :  { %v2871_v5 = vpack.c.bf16 %v153_v3, %v152_v2  ;;  %v155_v6 = vld [vmem:[#allocation6 + $0x18] sm:$0xff]  ;;  %v173_v7 = vld [vmem:[#allocation3] sm:$0xff]  ;;  %v157_v10 = vld [vmem:[#allocation8 + $0x8] sm:$0xff]  ;;  %s1840_s29 = sshll.u32 %s3645_s8, 4  ;;  %s1841_s29 = int_to_ptr.vmem [resolvable:$true] %s1840_s29 }
  0xa6   :  { %v2875_v8 = vpack.c.bf16 %v155_v6, %v154_v4  ;;  %2211 = vmatprep.mubr.msk.f32.mxu1 %vm187_vm1, %v173_v7  ;;  %v156_v9 = vld [vmem:[#allocation8] sm:$0xff]  ;;  %v158_v12 = vld [vmem:[#allocation8 + $0x10] sm:$0xff]  ;;  %v159_v13 = vld [vmem:[#allocation8 + $0x18] sm:$0xff]  ;;  %s3573_s17 = scalar_lea.vmem %s1841_s29, 256  ;;  %p3578_p3 = scmp.lt.s32.totalorder %s1841_s29, %s1841_s29 }
  0xa7   :  { %2872 = vmatprep.subr.bf16.mxu1 %v2871_v5  ;;  %v3854_v11 = vpack.c.bf16 %v157_v10, %v156_v9  ;;  %v3858_v14 = vpack.c.bf16 %v159_v13, %v158_v12  ;;  %v174_v15 = vld [vmem:[#allocation3 + $0x8] sm:$0xff]  ;;  %v160_v16 = vld [vmem:[#allocation8 + $0x20] sm:$0xff]  ;;  %v175_v18 = vld [vmem:[#allocation3 + $0x10] sm:$0xff]  ;;  %p3574_p2 = scmp.ne.s32.totalorder %s1841_s29, %s3573_s17  ;;  %p3579_p4 = scmp.lt.s32.totalorder %s3573_s17, %s3573_s17 }
  0xa8   :  { %2874 = vmatpush3.bf16.msra.mxu1 %v2871_v5  ;;  %v161_v17 = vld [vmem:[#allocation8 + $0x28] sm:$0xff]  ;;  %v162_v20 = vld [vmem:[#allocation8 + $0x30] sm:$0xff]  ;;  %v163_v21 = vld [vmem:[#allocation8 + $0x38] sm:$0xff] }
  0xa9   :  { %2876 = vmatprep.subr.bf16.mxu1 %v2875_v8  ;;  %2905 = vmatpush3.bf16.msra.mxu0 %v3854_v11  ;;  %v3864_v19 = vpack.c.bf16 %v161_v17, %v160_v16  ;;  %v176_v22 = vld [vmem:[#allocation3 + $0x18] sm:$0xff]  ;;  %v177_v23 = vld [vmem:[#allocation3 + $0x20] sm:$0xff]  ;;  %v3871_v24 = vpack.c.bf16 %v163_v21, %v162_v20  ;;  %v165_v26 = vld [vmem:[#allocation8 + $0x48] sm:$0xff]  ;;  %p3580_p5 = por %p3579_p4, %p3578_p3 }
  0xaa   :  { %2906 = vmatprep.subr.bf16.mxu0 %v3642_v0  ;;  %v164_v25 = vld [vmem:[#allocation8 + $0x40] sm:$0xff]  ;;  %v178_v27 = vld [vmem:[#allocation3 + $0x28] sm:$0xff]  ;;  %v179_v28 = vld [vmem:[#allocation3 + $0x30] sm:$0xff] }
  0xab   :  { %v3879_v29 = vpack.c.bf16 %v165_v26, %v164_v25  ;;  %v166_v30 = vld [vmem:[#allocation8 + $0x50] sm:$0xff]  ;;  %v167_v31 = vld [vmem:[#allocation8 + $0x58] sm:$0xff]  ;;  %v168_v34 = vld [vmem:[#allocation8 + $0x60] sm:$0xff]  ;;  %p3581_p6 = pnand %p3580_p5, %p3574_p2 }
  0xac   :  { %2878 = vmatpush3.bf16.msra.mxu1 %v2875_v8  ;;  %v180_v32 = vld [vmem:[#allocation3 + $0x38] sm:$0xff]  ;;  %v3887_v33 = vpack.c.bf16 %v167_v31, %v166_v30  ;;  %v169_v35 = vld [vmem:[#allocation8 + $0x68] sm:$0xff]  ;;  %v170_v37 = vld [vmem:[#allocation8 + $0x70] sm:$0xff] }
  0xad   :  { %2879 = vmatprep.subr.bf16.mxu1 %v3642_v0  ;;  %2908 = vmatpush3.bf16.msra.mxu0 %v3858_v14  ;;  %v3896_v36 = vpack.c.bf16 %v169_v35, %v168_v34  ;;  %v171_v38 = vld [vmem:[#allocation8 + $0x78] sm:$0xff]  ;;  %v1860_v40 = vld [vmem:[#allocation9] ss:$0 sm:$0xff]  ;;  %v929_v25 = vld [vmem:[#allocation11 + $0x20] sm:$0xff] }
  0xae   :  { %2909 = vmatprep.subr.bf16.mxu0 %v3642_v0  ;;  %v3902_v39 = vpack.c.bf16 %v171_v38, %v170_v37  ;;  %v927_v21 = vld [vmem:[#allocation11 + $0x10] sm:$0xff]  ;;  %v930_v26 = vld [vmem:[#allocation11 + $0x28] sm:$0xff]  ;;  %v933_v31 = vld [vmem:[#allocation11 + $0x40] sm:$0xff] }
  0xaf   :  { %2212 = vmatmul.mubr.msk.f32.vlgmr.msra.gmra.mrb[0].mxu1 %vm187_vm1, %v174_v15  ;;  %v935_v34 = vld [vmem:[#allocation11 + $0x50] sm:$0xff]  ;;  %v936_v35 = vld [vmem:[#allocation11 + $0x58] sm:$0xff]  ;;  %v937_v37 = vld [vmem:[#allocation11 + $0x60] sm:$0xff] }
  0xb0   :  { %2881 = vmatpush3.bf16.msra.mxu1 %v3854_v11  ;;  %2214 = vmatprep.mubr.msk.f32.mxu1 %vm187_vm1, %v175_v18  ;;  %v938_v38 = vld [vmem:[#allocation11 + $0x68] sm:$0xff] }
  0xb1   :  { %2882 = vmatprep.subr.bf16.mxu1 %v3642_v0  ;;  %2911 = vmatpush3.bf16.msra.mxu0 %v3864_v19 }
  0xb2   :  { %2912 = vmatprep.subr.bf16.mxu0 %v3642_v0 }
  0xb3   :  { %2215 = vmatmul.mubr.msk.f32.gmra.mrb[2].mxu1 %vm187_vm1, %v176_v22  ;;  %v928_v22 = vld [vmem:[#allocation11 + $0x18] sm:$0xff] }
  0xb4   :  { %2884 = vmatpush3.bf16.msra.mxu1 %v3858_v14  ;;  %2217 = vmatprep.mubr.msk.f32.mxu1 %vm187_vm1, %v177_v23  ;;  %v3075_v23 = vpack.c.bf16 %v928_v22, %v927_v21 }
  0xb5   :  { %2885 = vmatprep.subr.bf16.mxu1 %v3642_v0  ;;  %2914 = vmatpush3.bf16.msra.mxu0 %v3871_v24 }
  0xb6   :  { %2915 = vmatprep.subr.bf16.mxu0 %v3642_v0 }
  0xb7   :  { %2218 = vmatmul.mubr.msk.f32.gmra.mrb[4].mxu1 %vm187_vm1, %v178_v27  ;;  %v3079_v27 = vpack.c.bf16 %v930_v26, %v929_v25 }
  0xb8   :  { %2887 = vmatpush3.bf16.msra.mxu1 %v3864_v19  ;;  %2220 = vmatprep.mubr.msk.f32.mxu1 %vm187_vm1, %v179_v28  ;;  %v931_v28 = vld [vmem:[#allocation11 + $0x30] sm:$0xff] }
  0xb9   :  { %2888 = vmatprep.subr.bf16.mxu1 %v3642_v0  ;;  %2917 = vmatpush3.bf16.msra.mxu0 %v3879_v29 }
  0xba   :  { %2918 = vmatprep.subr.bf16.mxu0 %v3642_v0 }
  0xbb   :  { %2221 = vmatmul.mubr.msk.f32.gmra.mrb[6].mxu1 %vm187_vm1, %v180_v32  ;;  %v934_v32 = vld [vmem:[#allocation11 + $0x48] sm:$0xff] }
  0xbc   :  { %2890 = vmatpush3.bf16.msra.mxu1 %v3871_v24  ;;  %2255 = vmatprep.mubr.msk.f32.mxu1 %vm3643_vm0, %v3644_v1 }
  0xbd   :  { %2891 = vmatprep.subr.bf16.mxu1 %v3642_v0  ;;  %2920 = vmatpush3.bf16.msra.mxu0 %v3887_v33 }
  0xbe   :  { %2921 = vmatprep.subr.bf16.mxu0 %v3642_v0 }
  0xc0   :  { %2893 = vmatpush3.bf16.msra.mxu1 %v3879_v29 }
  0xc1   :  { %2894 = vmatprep.subr.bf16.mxu1 %v3642_v0  ;;  %2923 = vmatpush3.bf16.msra.mxu0 %v3896_v36 }
  0xc2   :  { %2924 = vmatprep.subr.bf16.mxu0 %v3642_v0 }
  0xc4   :  { %2896 = vmatpush3.bf16.msra.mxu1 %v3887_v33 }
  0xc5   :  { %2897 = vmatprep.subr.bf16.mxu1 %v3642_v0  ;;  %2926 = vmatpush3.bf16.msra.mxu0 %v3902_v39 }
  0xc6   :  { %2951 = vmatprep.subr.bf16.mxu0 %v3642_v0 }
  0xc8   :  { %2899 = vmatpush3.bf16.msra.mxu1 %v3896_v36 }
  0xc9   :  { %2900 = vmatprep.subr.bf16.mxu1 %v3642_v0 }
  0xcc   :  { %2902 = vmatpush3.bf16.msra.mxu1 %v3902_v39 }
  0xcd   :  { %2927 = vmatprep.subr.bf16.mxu1 %v3642_v0 }
  0xcf   :  { %2256 = vmatmul.mubr.f32.vlgmr.msra.gmra.mrb[8].mxu1 %v3644_v1 }
  0xd0   :  { %2929 = vmatpush3.bf16.msra.mxu1 %v3854_v11  ;;  %2325 = vmatprep.mubr.msk.f32.mxu1 %vm3643_vm0, %v3644_v1 }
  0xd1   :  { %2930 = vmatprep.subr.bf16.mxu1 %v3642_v0 }
  0xd4   :  { %2932 = vmatpush3.bf16.msra.mxu1 %v3858_v14 }
  0xd5   :  { %2933 = vmatprep.subr.bf16.mxu1 %v3642_v0 }
  0xd8   :  { %2935 = vmatpush3.bf16.msra.mxu1 %v3864_v19 }
  0xd9   :  { %2936 = vmatprep.subr.bf16.mxu1 %v3642_v0 }
  0xdc   :  { %2938 = vmatpush3.bf16.msra.mxu1 %v3871_v24 }
  0xdd   :  { %2939 = vmatprep.subr.bf16.mxu1 %v3642_v0 }
  0xe0   :  { %2941 = vmatpush3.bf16.msra.mxu1 %v3879_v29 }
  0xe1   :  { %2942 = vmatprep.subr.bf16.mxu1 %v3642_v0 }
  0xe4   :  { %2944 = vmatpush3.bf16.msra.mxu1 %v3887_v33 }
  0xe5   :  { %2945 = vmatprep.subr.bf16.mxu1 %v3642_v0 }
  0xe8   :  { %2947 = vmatpush3.bf16.msra.mxu1 %v3896_v36 }
  0xe9   :  { %2948 = vmatprep.subr.bf16.mxu1 %v3642_v0 }
  0xec   :  { %2950 = vmatpush3.bf16.msra.mxu1 %v3902_v39 }
  0xed   :  { %2975 = vmatprep.subr.bf16.mxu1 %v3642_v0 }
 0x182   :  { %v2213_v41 = vpop.f32.mrb[0].mxu1 }
 0x183   :  { %v284_v42 = vadd.f32 %v2213_v41, %v1860_v40  ;;  %v278_v43 = vpop.f32.mrb[1].mxu1  ;;  %v940_v41 = vld [vmem:[#allocation11 + $0x78] sm:$0xff] }
 0x184   :  { %v279_v56 = vadd.f32 %v1860_v40, %v278_v43  ;;  %v941_v43 = vld [vmem:[#allocation12] sm:$0xff] }
 0x186   :  { %v2216_v44 = vpop.f32.mrb[2].mxu1 }
 0x187   :  { %v3931_v45 = vadd.f32 %v2216_v44, %v1860_v40  ;;  %v288_v46 = vpop.f32.mrb[3].mxu1  ;;  %v942_v44 = vld [vmem:[#allocation12 + $0x8] sm:$0xff] }
 0x188   :  { %v289_v47 = vadd.f32 %v1860_v40, %v288_v46  ;;  %v943_v46 = vld [vmem:[#allocation12 + $0x10] sm:$0xff] }
 0x18a   :  { %v2219_v48 = vpop.f32.mrb[4].mxu1 }
 0x18b   :  { %v3933_v49 = vadd.f32 %v2219_v48, %v1860_v40  ;;  %v298_v50 = vpop.f32.mrb[5].mxu1 }
 0x18c   :  { %v3935_v51 = vadd.f32 %v1860_v40, %v298_v50  ;;  %v946_v50 = vld [vmem:[#allocation12 + $0x28] sm:$0xff] }
 0x18e   :  { %v2222_v52 = vpop.f32.mrb[6].mxu1 }
 0x18f   :  { %v3937_v53 = vadd.f32 %v2222_v52, %v1860_v40  ;;  %v308_v54 = vpop.f32.mrb[7].mxu1  ;;  %v947_v52 = vld [vmem:[#allocation12 + $0x30] sm:$0xff] }
 0x190   :  { %v3939_v55 = vadd.f32 %v1860_v40, %v308_v54  ;;  %v939_v40 = vld [vmem:[#allocation11 + $0x70] sm:$0xff]  ;;  %v948_v54 = vld [vmem:[#allocation12 + $0x38] sm:$0xff] }
 0x1a2   :  { %v392_v57 = vpop.f32.mrb[8].mxu1 }
 0x1a3   :  { %v396_v58 = vadd.f32 %v392_v57, %v279_v56  ;;  %v2257_v59 = vpop.f32.mrb[9].mxu1  ;;  %v4066_v56 = vpack.c.bf16 %v948_v54, %v947_v52  ;;  %v949_v57 = vld [vmem:[#allocation12 + $0x40] sm:$0xff]  ;;  %v1681_v54 = vld [vmem:[#allocation15 + $0x10] sm:$0xff] }
 0x1a5   :  { %3343 = vtanh.f32 %v396_v58  ;;  %v950_v58 = vld [vmem:[#allocation12 + $0x48] sm:$0xff] }
 0x1a6   :  { %v4070_v59 = vpack.c.bf16 %v950_v58, %v949_v57 }
 0x1af   :  { %v3941_v60 = vpop.eup %3343 }
 0x1b0   :  { %2291 = vmatmul.mubr.f32.vlgmr.msra.gmra.mrb[0].mxu0 %v3941_v60 }
 0x1b1   :  { %2953 = vmatpush3.bf16.msra.mxu0 %v3854_v11  ;;  %2360 = vmatprep.mubr.msk.f32.mxu0 %vm3643_vm0, %v3644_v1 }
 0x1b2   :  { %2954 = vmatprep.subr.bf16.mxu0 %v3642_v0 }
 0x1b5   :  { %2956 = vmatpush3.bf16.msra.mxu0 %v3858_v14 }
 0x1b6   :  { %2957 = vmatprep.subr.bf16.mxu0 %v3642_v0 }
 0x1b9   :  { %2959 = vmatpush3.bf16.msra.mxu0 %v3864_v19 }
 0x1ba   :  { %2960 = vmatprep.subr.bf16.mxu0 %v3642_v0 }
 0x1bd   :  { %2962 = vmatpush3.bf16.msra.mxu0 %v3871_v24 }
 0x1be   :  { %2963 = vmatprep.subr.bf16.mxu0 %v3642_v0 }
 0x1c1   :  { %2965 = vmatpush3.bf16.msra.mxu0 %v3879_v29 }
 0x1c2   :  { %2966 = vmatprep.subr.bf16.mxu0 %v3642_v0 }
 0x1c5   :  { %2968 = vmatpush3.bf16.msra.mxu0 %v3887_v33 }
 0x1c6   :  { %2969 = vmatprep.subr.bf16.mxu0 %v3642_v0 }
 0x1c9   :  { %2971 = vmatpush3.bf16.msra.mxu0 %v3896_v36 }
 0x1ca   :  { %2972 = vmatprep.subr.bf16.mxu0 %v3642_v0 }
 0x1cd   :  { %2974 = vmatpush3.bf16.msra.mxu0 %v3902_v39 }
 0x1ce   :  { %2999 = vmatprep.subr.bf16.mxu0 %v3642_v0 }
 0x283   :  { %v467_v61 = vpop.f32.mrb[0].mxu0 }
 0x284   :  { %v471_v62 = vadd.f32 %v467_v61, %v284_v42  ;;  %v2292_v63 = vpop.f32.mrb[1].mxu0  ;;  %v3099_v42 = vpack.c.bf16 %v940_v41, %v939_v40  ;;  %v952_v61 = vld [vmem:[#allocation12 + $0x58] sm:$0xff] }
 0x285   :  { %v953_v63 = vld [vmem:[#allocation12 + $0x60] sm:$0xff] }
 0x286   :  { %3345 = vtanh.f32 %v471_v62 }
 0x290   :  { %v3962_v2 = vpop.eup %3345 }
 0x291   :  { %2326 = vmatmul.mubr.f32.vlgmr.msra.gmra.mrb[10].mxu1 %v3962_v2 }
 0x292   :  { %2977 = vmatpush3.bf16.msra.mxu1 %v3854_v11  ;;  %2395 = vmatprep.mubr.msk.f32.mxu1 %vm3643_vm0, %v3644_v1 }
 0x293   :  { %2978 = vmatprep.subr.bf16.mxu1 %v3642_v0 }
 0x296   :  { %2980 = vmatpush3.bf16.msra.mxu1 %v3858_v14 }
 0x297   :  { %2981 = vmatprep.subr.bf16.mxu1 %v3642_v0 }
 0x29a   :  { %2983 = vmatpush3.bf16.msra.mxu1 %v3864_v19 }
 0x29b   :  { %2984 = vmatprep.subr.bf16.mxu1 %v3642_v0 }
 0x29e   :  { %2986 = vmatpush3.bf16.msra.mxu1 %v3871_v24 }
 0x29f   :  { %2987 = vmatprep.subr.bf16.mxu1 %v3642_v0 }
 0x2a2   :  { %2989 = vmatpush3.bf16.msra.mxu1 %v3879_v29 }
 0x2a3   :  { %2990 = vmatprep.subr.bf16.mxu1 %v3642_v0 }
 0x2a6   :  { %2992 = vmatpush3.bf16.msra.mxu1 %v3887_v33 }
 0x2a7   :  { %2993 = vmatprep.subr.bf16.mxu1 %v3642_v0 }
 0x2aa   :  { %2995 = vmatpush3.bf16.msra.mxu1 %v3896_v36 }
 0x2ab   :  { %2996 = vmatprep.subr.bf16.mxu1 %v3642_v0 }
 0x2ae   :  { %2998 = vmatpush3.bf16.msra.mxu1 %v3902_v39 }
 0x2af   :  { %3023 = vmatprep.subr.bf16.mxu1 %v3642_v0 }
 0x364   :  { %v542_v3 = vpop.f32.mrb[10].mxu1 }
 0x365   :  { %v546_v4 = vadd.f32 %v542_v3, %v289_v47  ;;  %v2327_v5 = vpop.f32.mrb[11].mxu1  ;;  %v944_v47 = vld [vmem:[#allocation12 + $0x18] sm:$0xff] }
 0x366   :  { %v4058_v48 = vpack.c.bf16 %v944_v47, %v943_v46  ;;  %v956_v5 = vld [vmem:[#allocation12 + $0x78] sm:$0xff] }
 0x367   :  { %3347 = vtanh.f32 %v546_v4  ;;  %v955_v4 = vld [vmem:[#allocation12 + $0x70] sm:$0xff] }
 0x371   :  { %v3983_v6 = vpop.eup %3347 }
 0x372   :  { %2361 = vmatmul.mubr.f32.vlgmr.msra.gmra.mrb[2].mxu0 %v3983_v6 }
 0x373   :  { %3001 = vmatpush3.bf16.msra.mxu0 %v3854_v11  ;;  %2430 = vmatprep.mubr.msk.f32.mxu0 %vm3643_vm0, %v3644_v1 }
 0x374   :  { %3002 = vmatprep.subr.bf16.mxu0 %v3642_v0 }
 0x377   :  { %3004 = vmatpush3.bf16.msra.mxu0 %v3858_v14 }
 0x378   :  { %3005 = vmatprep.subr.bf16.mxu0 %v3642_v0 }
 0x37b   :  { %3007 = vmatpush3.bf16.msra.mxu0 %v3864_v19 }
 0x37c   :  { %3008 = vmatprep.subr.bf16.mxu0 %v3642_v0 }
 0x37f   :  { %3010 = vmatpush3.bf16.msra.mxu0 %v3871_v24 }
 0x380   :  { %3011 = vmatprep.subr.bf16.mxu0 %v3642_v0 }
 0x383   :  { %3013 = vmatpush3.bf16.msra.mxu0 %v3879_v29 }
 0x384   :  { %3014 = vmatprep.subr.bf16.mxu0 %v3642_v0 }
 0x387   :  { %3016 = vmatpush3.bf16.msra.mxu0 %v3887_v33 }
 0x388   :  { %3017 = vmatprep.subr.bf16.mxu0 %v3642_v0 }
 0x38b   :  { %3019 = vmatpush3.bf16.msra.mxu0 %v3896_v36 }
 0x38c   :  { %3020 = vmatprep.subr.bf16.mxu0 %v3642_v0 }
 0x38f   :  { %3022 = vmatpush3.bf16.msra.mxu0 %v3902_v39 }
 0x390   :  { %3047 = vmatprep.subr.bf16.mxu0 %v3642_v0 }
 0x445   :  { %v617_v7 = vpop.f32.mrb[2].mxu0 }
 0x446   :  { %v621_v8 = vadd.f32 %v617_v7, %v3931_v45  ;;  %v2362_v9 = vpop.f32.mrb[3].mxu0  ;;  %v4054_v45 = vpack.c.bf16 %v942_v44, %v941_v43 }
 0x448   :  { %3349 = vtanh.f32 %v621_v8 }
 0x452   :  { %v4005_v10 = vpop.eup %3349 }
 0x453   :  { %2396 = vmatmul.mubr.f32.vlgmr.msra.gmra.mrb[12].mxu1 %v4005_v10 }
 0x454   :  { %3025 = vmatpush3.bf16.msra.mxu1 %v3854_v11  ;;  %2465 = vmatprep.mubr.msk.f32.mxu1 %vm3643_vm0, %v3644_v1 }
 0x455   :  { %3026 = vmatprep.subr.bf16.mxu1 %v3642_v0 }
 0x458   :  { %3028 = vmatpush3.bf16.msra.mxu1 %v3858_v14 }
 0x459   :  { %3029 = vmatprep.subr.bf16.mxu1 %v3642_v0 }
 0x45c   :  { %3031 = vmatpush3.bf16.msra.mxu1 %v3864_v19 }
 0x45d   :  { %3032 = vmatprep.subr.bf16.mxu1 %v3642_v0 }
 0x460   :  { %3034 = vmatpush3.bf16.msra.mxu1 %v3871_v24 }
 0x461   :  { %3035 = vmatprep.subr.bf16.mxu1 %v3642_v0 }
 0x464   :  { %3037 = vmatpush3.bf16.msra.mxu1 %v3879_v29 }
 0x465   :  { %3038 = vmatprep.subr.bf16.mxu1 %v3642_v0 }
 0x468   :  { %3040 = vmatpush3.bf16.msra.mxu1 %v3887_v33 }
 0x469   :  { %3041 = vmatprep.subr.bf16.mxu1 %v3642_v0 }
 0x46c   :  { %3043 = vmatpush3.bf16.msra.mxu1 %v3896_v36 }
 0x46d   :  { %3044 = vmatprep.subr.bf16.mxu1 %v3642_v0 }
 0x470   :  { %3046 = vmatpush3.bf16.msra.mxu1 %v3902_v39 }
 0x526   :  { %v692_v12 = vpop.f32.mrb[12].mxu1 }
 0x527   :  { %v696_v13 = vadd.f32 %v692_v12, %v3935_v51  ;;  %v2397_v15 = vpop.f32.mrb[13].mxu1 }
 0x529   :  { %3351 = vtanh.f32 %v696_v13 }
 0x533   :  { %v4026_v16 = vpop.eup %3351 }
 0x534   :  { %2431 = vmatmul.mubr.f32.vlgmr.msra.gmra.mrb[4].mxu0 %v4026_v16 }
 0x535   :  { %3049 = vmatpush3.bf16.msra.mxu0 %v3854_v11  ;;  %2500 = vmatprep.mubr.msk.f32.mxu0 %vm3643_vm0, %v3644_v1  ;;  %v925_v11 = vld [vmem:[#allocation11] sm:$0xff] }
 0x536   :  { %3050 = vmatprep.subr.bf16.mxu0 %v3642_v0 }
 0x539   :  { %3052 = vmatpush3.bf16.msra.mxu0 %v3858_v14  ;;  %v926_v14 = vld [vmem:[#allocation11 + $0x8] sm:$0xff] }
 0x53a   :  { %3053 = vmatprep.subr.bf16.mxu0 %v3642_v0  ;;  %v3071_v17 = vpack.c.bf16 %v926_v14, %v925_v11 }
 0x53c   :  { %3072 = vmatprep.subr.bf16.mxu1 %v3071_v17 }
 0x53d   :  { %3055 = vmatpush3.bf16.msra.mxu0 %v3864_v19 }
 0x53e   :  { %3056 = vmatprep.subr.bf16.mxu0 %v3642_v0 }
 0x541   :  { %3058 = vmatpush3.bf16.msra.mxu0 %v3871_v24 }
 0x542   :  { %3059 = vmatprep.subr.bf16.mxu0 %v3642_v0 }
 0x545   :  { %3061 = vmatpush3.bf16.msra.mxu0 %v3879_v29  ;;  %v932_v29 = vld [vmem:[#allocation11 + $0x38] sm:$0xff] }
 0x546   :  { %3062 = vmatprep.subr.bf16.mxu0 %v3642_v0  ;;  %v3083_v30 = vpack.c.bf16 %v932_v29, %v931_v28 }
 0x549   :  { %3064 = vmatpush3.bf16.msra.mxu0 %v3887_v33  ;;  %v3087_v33 = vpack.c.bf16 %v934_v32, %v933_v31 }
 0x54a   :  { %3065 = vmatprep.subr.bf16.mxu0 %v3642_v0 }
 0x54d   :  { %3067 = vmatpush3.bf16.msra.mxu0 %v3896_v36  ;;  %v3091_v36 = vpack.c.bf16 %v936_v35, %v935_v34 }
 0x54e   :  { %3068 = vmatprep.subr.bf16.mxu0 %v3642_v0 }
 0x551   :  { %3070 = vmatpush3.bf16.msra.mxu0 %v3902_v39  ;;  %v3095_v39 = vpack.c.bf16 %v938_v38, %v937_v37 }
 0x552   :  { %3103 = vmatprep.subr.bf16.mxu0 %v3642_v0 }
 0x607   :  { %v767_v18 = vpop.f32.mrb[4].mxu0 }
 0x608   :  { %v771_v19 = vadd.f32 %v767_v18, %v3933_v49  ;;  %v2432_v20 = vpop.f32.mrb[5].mxu0  ;;  %v945_v49 = vld [vmem:[#allocation12 + $0x20] sm:$0xff] }
 0x609   :  { %v4062_v51 = vpack.c.bf16 %v946_v50, %v945_v49  ;;  %v4137_v20 = vld [vmem:[#allocation14] ss:$0 sm:$0xff] }
 0x60a   :  { %3353 = vtanh.f32 %v771_v19 }
 0x614   :  { %v3354_v24 = vpop.eup %3353 }
 0x615   :  { %2466 = vmatmul.mubr.f32.vlgmr.msra.gmra.mrb[14].mxu1 %v3354_v24 }
 0x616   :  { %3074 = vmatpush3.bf16.msra.mxu1 %v3071_v17  ;;  %2535 = vmatprep.mubr.f32.mxu1 %v3941_v60  ;;  %v951_v60 = vld [vmem:[#allocation12 + $0x50] sm:$0xff] }
 0x617   :  { %3076 = vmatprep.subr.bf16.mxu1 %v3075_v23  ;;  %v4074_v62 = vpack.c.bf16 %v952_v61, %v951_v60  ;;  %v1684_v60 = vld [vmem:[#allocation15 + $0x28] sm:$0xff]  ;;  %v1685_v61 = vld [vmem:[#allocation15 + $0x30] sm:$0xff] }
 0x61a   :  { %3078 = vmatpush3.bf16.msra.mxu1 %v3075_v23 }
 0x61b   :  { %3080 = vmatprep.subr.bf16.mxu1 %v3079_v27 }
 0x61e   :  { %3082 = vmatpush3.bf16.msra.mxu1 %v3079_v27 }
 0x61f   :  { %3084 = vmatprep.subr.bf16.mxu1 %v3083_v30 }
 0x622   :  { %3086 = vmatpush3.bf16.msra.mxu1 %v3083_v30 }
 0x623   :  { %3088 = vmatprep.subr.bf16.mxu1 %v3087_v33 }
 0x626   :  { %3090 = vmatpush3.bf16.msra.mxu1 %v3087_v33 }
 0x627   :  { %3092 = vmatprep.subr.bf16.mxu1 %v3091_v36 }
 0x62a   :  { %3094 = vmatpush3.bf16.msra.mxu1 %v3091_v36 }
 0x62b   :  { %3096 = vmatprep.subr.bf16.mxu1 %v3095_v39 }
 0x62e   :  { %3098 = vmatpush3.bf16.msra.mxu1 %v3095_v39 }
 0x62f   :  { %3100 = vmatprep.subr.bf16.mxu1 %v3099_v42 }
 0x632   :  { %3102 = vmatpush3.bf16.msra.mxu1 %v3099_v42 }
 0x633   :  { %3127 = vmatprep.subr.bf16.mxu1 %v3642_v0 }
 0x635   :  { %2536 = vmatmul.mubr.f32.vlgmr.msra.gmra.mrb[16].mxu1 %v3962_v2  ;;  %v954_v2 = vld [vmem:[#allocation12 + $0x68] sm:$0xff] }
 0x636   :  { %2538 = vmatprep.mubr.f32.mxu1 %v3983_v6  ;;  %3129 = vmatpush3.bf16.msra.mxu1 %v4054_v45  ;;  %v4078_v3 = vpack.c.bf16 %v954_v2, %v953_v63  ;;  %v4082_v6 = vpack.c.bf16 %v956_v5, %v955_v4  ;;  %v1687_v2 = vld [vmem:[#allocation15 + $0x40] sm:$0xff]  ;;  %v1689_v5 = vld [vmem:[#allocation15 + $0x50] sm:$0xff] }
 0x637   :  { %3130 = vmatprep.subr.bf16.mxu1 %v3642_v0 }
 0x639   :  { %2539 = vmatmul.mubr.f32.gmra.mrb[18].mxu1 %v4005_v10 }
 0x63a   :  { %2541 = vmatprep.mubr.f32.mxu1 %v4026_v16  ;;  %3132 = vmatpush3.bf16.msra.mxu1 %v4058_v48 }
 0x63b   :  { %3133 = vmatprep.subr.bf16.mxu1 %v3642_v0 }
 0x63d   :  { %2542 = vmatmul.mubr.f32.gmra.mrb[20].mxu1 %v3354_v24 }
 0x63e   :  { %3135 = vmatpush3.bf16.msra.mxu1 %v4062_v51 }
 0x63f   :  { %3136 = vmatprep.subr.bf16.mxu1 %v3642_v0 }
 0x642   :  { %3138 = vmatpush3.bf16.msra.mxu1 %v4066_v56 }
 0x643   :  { %3139 = vmatprep.subr.bf16.mxu1 %v3642_v0 }
 0x646   :  { %3141 = vmatpush3.bf16.msra.mxu1 %v4070_v59 }
 0x647   :  { %3142 = vmatprep.subr.bf16.mxu1 %v3642_v0 }
 0x64a   :  { %3144 = vmatpush3.bf16.msra.mxu1 %v4074_v62 }
 0x64b   :  { %3145 = vmatprep.subr.bf16.mxu1 %v3642_v0 }
 0x64e   :  { %3147 = vmatpush3.bf16.msra.mxu1 %v4078_v3 }
 0x64f   :  { %3148 = vmatprep.subr.bf16.mxu1 %v3642_v0 }
 0x652   :  { %3150 = vmatpush3.bf16.msra.mxu1 %v4082_v6 }
 0x653   :  { %3175 = vmatprep.subr.bf16.mxu1 %v3642_v0 }
 0x6e8   :  { %v842_v7 = vpop.f32.mrb[14].mxu1 }
 0x6e9   :  { %v846_v8 = vadd.f32 %v842_v7, %v3939_v55  ;;  %v2467_v9 = vpop.f32.mrb[15].mxu1 }
 0x6ea   :  { %v1692_v9 = vld [vmem:[#allocation15 + $0x68] sm:$0xff] }
 0x6eb   :  { %3355 = vtanh.f32 %v846_v8  ;;  %v1691_v8 = vld [vmem:[#allocation15 + $0x60] sm:$0xff] }
 0x6f5   :  { %v3356_v10 = vpop.eup %3355 }
 0x6f6   :  { %2501 = vmatmul.mubr.f32.vlgmr.msra.gmra.mrb[6].mxu0 %v3356_v10  ;;  %2544 = vmatprep.mubr.f32.mxu1 %v3356_v10  ;;  %v3319_v10 = vpack.c.bf16 %v1692_v9, %v1691_v8 }
 0x6f7   :  { %3105 = vmatpush3.bf16.msra.mxu0 %v4054_v45  ;;  %2579 = vmatprep.mubr.msk.f32.mxu0 %vm3643_vm0, %v3644_v1 }
 0x6f8   :  { %3106 = vmatprep.subr.bf16.mxu0 %v3642_v0 }
 0x6fb   :  { %3108 = vmatpush3.bf16.msra.mxu0 %v4058_v48 }
 0x6fc   :  { %3109 = vmatprep.subr.bf16.mxu0 %v3642_v0 }
 0x6ff   :  { %3111 = vmatpush3.bf16.msra.mxu0 %v4062_v51 }
 0x700   :  { %3112 = vmatprep.subr.bf16.mxu0 %v3642_v0 }
 0x703   :  { %3114 = vmatpush3.bf16.msra.mxu0 %v4066_v56 }
 0x704   :  { %3115 = vmatprep.subr.bf16.mxu0 %v3642_v0 }
 0x707   :  { %3117 = vmatpush3.bf16.msra.mxu0 %v4070_v59 }
 0x708   :  { %v4098_v55 = vpop.f32.mrb[16].mxu1  ;;  %3118 = vmatprep.subr.bf16.mxu0 %v3642_v0 }
 0x709   :  { %v1038_v12 = vpop.f32.mrb[17].mxu1  ;;  %v1044_v27 = vadd.f32 %v4098_v55, %v4137_v20  ;;  %v1693_v55 = vld [vmem:[#allocation15 + $0x70] sm:$0xff] }
 0x70a   :  { %v1039_v21 = vadd.f32 %v4137_v20, %v1038_v12  ;;  %v1694_v12 = vld [vmem:[#allocation15 + $0x78] sm:$0xff] }
 0x70b   :  { %3120 = vmatpush3.bf16.msra.mxu0 %v4074_v62 }
 0x70c   :  { %v4102_v13 = vpop.f32.mrb[18].mxu1  ;;  %3121 = vmatprep.subr.bf16.mxu0 %v3642_v0 }
 0x70d   :  { %v4105_v15 = vpop.f32.mrb[19].mxu1  ;;  %v1054_v37 = vadd.f32 %v4102_v13, %v4137_v20  ;;  %v3323_v13 = vpack.c.bf16 %v1694_v12, %v1693_v55 }
 0x70e   :  { %v1049_v32 = vadd.f32 %v4137_v20, %v4105_v15 }
 0x70f   :  { %3123 = vmatpush3.bf16.msra.mxu0 %v4078_v3 }
 0x710   :  { %v4108_v16 = vpop.f32.mrb[20].mxu1  ;;  %3124 = vmatprep.subr.bf16.mxu0 %v3642_v0 }
 0x711   :  { %v4111_v11 = vpop.f32.mrb[21].mxu1  ;;  %v1064_v49 = vadd.f32 %v4108_v16, %v4137_v20 }
 0x712   :  { %v1059_v42 = vadd.f32 %v4137_v20, %v4111_v11 }
 0x713   :  { %3126 = vmatpush3.bf16.msra.mxu0 %v4082_v6 }
 0x714   :  { %3151 = vmatprep.subr.bf16.mxu0 %v3642_v0 }
 0x716   :  { %2580 = vmatmul.mubr.f32.vlgmr.msra.gmra.mrb[8].mxu0 %v3644_v1 }
 0x717   :  { %3153 = vmatpush3.bf16.msra.mxu0 %v4054_v45  ;;  %2649 = vmatprep.mubr.msk.f32.mxu0 %vm3643_vm0, %v3644_v1 }
 0x718   :  { %3154 = vmatprep.subr.bf16.mxu0 %v3642_v0 }
 0x71b   :  { %3156 = vmatpush3.bf16.msra.mxu0 %v4058_v48 }
 0x71c   :  { %3157 = vmatprep.subr.bf16.mxu0 %v3642_v0 }
 0x71f   :  { %3159 = vmatpush3.bf16.msra.mxu0 %v4062_v51 }
 0x720   :  { %3160 = vmatprep.subr.bf16.mxu0 %v3642_v0 }
 0x723   :  { %3162 = vmatpush3.bf16.msra.mxu0 %v4066_v56 }
 0x724   :  { %3163 = vmatprep.subr.bf16.mxu0 %v3642_v0 }
 0x727   :  { %3165 = vmatpush3.bf16.msra.mxu0 %v4070_v59 }
 0x728   :  { %3166 = vmatprep.subr.bf16.mxu0 %v3642_v0 }
 0x72b   :  { %3168 = vmatpush3.bf16.msra.mxu0 %v4074_v62 }
 0x72c   :  { %3169 = vmatprep.subr.bf16.mxu0 %v3642_v0 }
 0x72f   :  { %3171 = vmatpush3.bf16.msra.mxu0 %v4078_v3 }
 0x730   :  { %3172 = vmatprep.subr.bf16.mxu0 %v3642_v0 }
 0x733   :  { %3174 = vmatpush3.bf16.msra.mxu0 %v4082_v6 }
 0x734   :  { %3199 = vmatprep.subr.bf16.mxu0 %v3642_v0 }
 0x7c9   :  { %v917_v14 = vpop.f32.mrb[6].mxu0 }
 0x7ca   :  { %v921_v17 = vadd.f32 %v917_v14, %v3937_v53  ;;  %v2502_v18 = vpop.f32.mrb[7].mxu0 }
 0x7cb   :  { %v1870_v18 = vld [vmem:[#allocation17] ss:$0 sm:$0xff] }
 0x7cc   :  { %3357 = vtanh.f32 %v921_v17 }
 0x7d6   :  { %v3358_v19 = vpop.eup %3357 }
 0x7d7   :  { %924 = vst [vmem:[#allocation19] sm:$0xff] %v3358_v19  ;;  %2545 = vmatmul.mubr.f32.gmra.mrb[22].mxu1 %v3358_v19 }
 0x7d8   :  { %2614 = vmatprep.mubr.msk.f32.mxu1 %vm3643_vm0, %v3644_v1 }
 0x7e9   :  { %v1152_v22 = vpop.f32.mrb[8].mxu0 }
 0x7ea   :  { %v1156_v23 = vadd.f32 %v1152_v22, %v1039_v21  ;;  %v2581_v24 = vpop.f32.mrb[9].mxu0 }
 0x7ec   :  { %3359 = vtanh.f32 %v1156_v23 }
 0x7f6   :  { %v4140_v25 = vpop.eup %3359 }
 0x7f7   :  { %2615 = vmatmul.mubr.f32.vlgmr.msra.gmra.mrb[24].mxu1 %v4140_v25 }
 0x7f8   :  { %3177 = vmatpush3.bf16.msra.mxu1 %v4054_v45  ;;  %2684 = vmatprep.mubr.msk.f32.mxu1 %vm3643_vm0, %v3644_v1 }
 0x7f9   :  { %3178 = vmatprep.subr.bf16.mxu1 %v3642_v0 }
 0x7fc   :  { %3180 = vmatpush3.bf16.msra.mxu1 %v4058_v48 }
 0x7fd   :  { %3181 = vmatprep.subr.bf16.mxu1 %v3642_v0 }
 0x800   :  { %3183 = vmatpush3.bf16.msra.mxu1 %v4062_v51 }
 0x801   :  { %3184 = vmatprep.subr.bf16.mxu1 %v3642_v0 }
 0x804   :  { %3186 = vmatpush3.bf16.msra.mxu1 %v4066_v56 }
 0x805   :  { %3187 = vmatprep.subr.bf16.mxu1 %v3642_v0 }
 0x808   :  { %3189 = vmatpush3.bf16.msra.mxu1 %v4070_v59 }
 0x809   :  { %3190 = vmatprep.subr.bf16.mxu1 %v3642_v0 }
 0x80c   :  { %3192 = vmatpush3.bf16.msra.mxu1 %v4074_v62 }
 0x80d   :  { %3193 = vmatprep.subr.bf16.mxu1 %v3642_v0 }
 0x810   :  { %3195 = vmatpush3.bf16.msra.mxu1 %v4078_v3 }
 0x811   :  { %3196 = vmatprep.subr.bf16.mxu1 %v3642_v0 }
 0x814   :  { %3198 = vmatpush3.bf16.msra.mxu1 %v4082_v6 }
 0x815   :  { %3223 = vmatprep.subr.bf16.mxu1 %v3642_v0 }
 0x8aa   :  { %v4161_v53 = vpop.f32.mrb[22].mxu1 }
 0x8ab   :  { %v4163_v26 = vpop.f32.mrb[23].mxu1 }
 0x8ac   :  { %v1069_v15 = vadd.f32 %v4137_v20, %v4163_v26 }
 0x8ca   :  { %v1226_v28 = vpop.f32.mrb[24].mxu1 }
 0x8cb   :  { %v1230_v29 = vadd.f32 %v1226_v28, %v1044_v27  ;;  %v2616_v30 = vpop.f32.mrb[25].mxu1 }
 0x8cd   :  { %3361 = vtanh.f32 %v1230_v29 }
 0x8d7   :  { %v4167_v31 = vpop.eup %3361 }
 0x8d8   :  { %2650 = vmatmul.mubr.f32.vlgmr.msra.gmra.mrb[10].mxu0 %v4167_v31 }
 0x8d9   :  { %3201 = vmatpush3.bf16.msra.mxu0 %v4054_v45  ;;  %2719 = vmatprep.mubr.msk.f32.mxu0 %vm3643_vm0, %v3644_v1 }
 0x8da   :  { %3202 = vmatprep.subr.bf16.mxu0 %v3642_v0 }
 0x8dd   :  { %3204 = vmatpush3.bf16.msra.mxu0 %v4058_v48 }
 0x8de   :  { %3205 = vmatprep.subr.bf16.mxu0 %v3642_v0 }
 0x8e1   :  { %3207 = vmatpush3.bf16.msra.mxu0 %v4062_v51 }
 0x8e2   :  { %3208 = vmatprep.subr.bf16.mxu0 %v3642_v0 }
 0x8e5   :  { %3210 = vmatpush3.bf16.msra.mxu0 %v4066_v56 }
 0x8e6   :  { %3211 = vmatprep.subr.bf16.mxu0 %v3642_v0 }
 0x8e9   :  { %3213 = vmatpush3.bf16.msra.mxu0 %v4070_v59 }
 0x8ea   :  { %3214 = vmatprep.subr.bf16.mxu0 %v3642_v0 }
 0x8ed   :  { %3216 = vmatpush3.bf16.msra.mxu0 %v4074_v62 }
 0x8ee   :  { %3217 = vmatprep.subr.bf16.mxu0 %v3642_v0 }
 0x8f1   :  { %3219 = vmatpush3.bf16.msra.mxu0 %v4078_v3 }
 0x8f2   :  { %3220 = vmatprep.subr.bf16.mxu0 %v3642_v0 }
 0x8f5   :  { %3222 = vmatpush3.bf16.msra.mxu0 %v4082_v6 }
 0x8f6   :  { %3247 = vmatprep.subr.bf16.mxu0 %v3642_v0 }
 0x9ab   :  { %v1300_v33 = vpop.f32.mrb[10].mxu0 }
 0x9ac   :  { %v1304_v34 = vadd.f32 %v1300_v33, %v1049_v32  ;;  %v2651_v35 = vpop.f32.mrb[11].mxu0  ;;  %v1074_v32 = vadd.f32 %v4161_v53, %v4137_v20 }
 0x9ae   :  { %3363 = vtanh.f32 %v1304_v34 }
 0x9b8   :  { %v4190_v36 = vpop.eup %3363 }
 0x9b9   :  { %2685 = vmatmul.mubr.f32.vlgmr.msra.gmra.mrb[26].mxu1 %v4190_v36 }
 0x9ba   :  { %3225 = vmatpush3.bf16.msra.mxu1 %v4054_v45  ;;  %2754 = vmatprep.mubr.msk.f32.mxu1 %vm3643_vm0, %v3644_v1 }
 0x9bb   :  { %3226 = vmatprep.subr.bf16.mxu1 %v3642_v0 }
 0x9be   :  { %3228 = vmatpush3.bf16.msra.mxu1 %v4058_v48 }
 0x9bf   :  { %3229 = vmatprep.subr.bf16.mxu1 %v3642_v0 }
 0x9c2   :  { %3231 = vmatpush3.bf16.msra.mxu1 %v4062_v51 }
 0x9c3   :  { %3232 = vmatprep.subr.bf16.mxu1 %v3642_v0 }
 0x9c6   :  { %3234 = vmatpush3.bf16.msra.mxu1 %v4066_v56 }
 0x9c7   :  { %3235 = vmatprep.subr.bf16.mxu1 %v3642_v0 }
 0x9ca   :  { %3237 = vmatpush3.bf16.msra.mxu1 %v4070_v59 }
 0x9cb   :  { %3238 = vmatprep.subr.bf16.mxu1 %v3642_v0 }
 0x9ce   :  { %3240 = vmatpush3.bf16.msra.mxu1 %v4074_v62 }
 0x9cf   :  { %3241 = vmatprep.subr.bf16.mxu1 %v3642_v0 }
 0x9d2   :  { %3243 = vmatpush3.bf16.msra.mxu1 %v4078_v3 }
 0x9d3   :  { %3244 = vmatprep.subr.bf16.mxu1 %v3642_v0 }
 0x9d6   :  { %3246 = vmatpush3.bf16.msra.mxu1 %v4082_v6 }
 0x9d7   :  { %3271 = vmatprep.subr.bf16.mxu1 %v3642_v0 }
 0xa8c   :  { %v1374_v38 = vpop.f32.mrb[26].mxu1 }
 0xa8d   :  { %v1378_v39 = vadd.f32 %v1374_v38, %v1054_v37  ;;  %v2686_v40 = vpop.f32.mrb[27].mxu1 }
 0xa8f   :  { %3365 = vtanh.f32 %v1378_v39 }
 0xa99   :  { %v4213_v41 = vpop.eup %3365 }
 0xa9a   :  { %2720 = vmatmul.mubr.f32.vlgmr.msra.gmra.mrb[12].mxu0 %v4213_v41 }
 0xa9b   :  { %3249 = vmatpush3.bf16.msra.mxu0 %v4054_v45  ;;  %2789 = vmatprep.mubr.msk.f32.mxu0 %vm3643_vm0, %v3644_v1 }
 0xa9c   :  { %3250 = vmatprep.subr.bf16.mxu0 %v3642_v0 }
 0xa9f   :  { %3252 = vmatpush3.bf16.msra.mxu0 %v4058_v48 }
 0xaa0   :  { %3253 = vmatprep.subr.bf16.mxu0 %v3642_v0 }
 0xaa3   :  { %3255 = vmatpush3.bf16.msra.mxu0 %v4062_v51 }
 0xaa4   :  { %3256 = vmatprep.subr.bf16.mxu0 %v3642_v0 }
 0xaa7   :  { %3258 = vmatpush3.bf16.msra.mxu0 %v4066_v56 }
 0xaa8   :  { %3259 = vmatprep.subr.bf16.mxu0 %v3642_v0 }
 0xaab   :  { %3261 = vmatpush3.bf16.msra.mxu0 %v4070_v59 }
 0xaac   :  { %3262 = vmatprep.subr.bf16.mxu0 %v3642_v0 }
 0xaaf   :  { %3264 = vmatpush3.bf16.msra.mxu0 %v4074_v62 }
 0xab0   :  { %3265 = vmatprep.subr.bf16.mxu0 %v3642_v0 }
 0xab3   :  { %3267 = vmatpush3.bf16.msra.mxu0 %v4078_v3 }
 0xab4   :  { %3268 = vmatprep.subr.bf16.mxu0 %v3642_v0 }
 0xab7   :  { %3270 = vmatpush3.bf16.msra.mxu0 %v4082_v6 }
 0xb6d   :  { %v1448_v43 = vpop.f32.mrb[12].mxu0 }
 0xb6e   :  { %v1452_v44 = vadd.f32 %v1448_v43, %v1059_v42  ;;  %v2721_v46 = vpop.f32.mrb[13].mxu0 }
 0xb70   :  { %3367 = vtanh.f32 %v1452_v44 }
 0xb7a   :  { %v4235_v47 = vpop.eup %3367 }
 0xb7b   :  { %2755 = vmatmul.mubr.f32.vlgmr.msra.gmra.mrb[28].mxu1 %v4235_v47 }
 0xb7c   :  { %3273 = vmatpush3.bf16.msra.mxu1 %v4054_v45  ;;  %2824 = vmatprep.mubr.msk.f32.mxu1 %vm3643_vm0, %v3644_v1  ;;  %v1679_v1 = vld [vmem:[#allocation15] sm:$0xff]  ;;  %v1680_v45 = vld [vmem:[#allocation15 + $0x8] sm:$0xff] }
 0xb7d   :  { %3274 = vmatprep.subr.bf16.mxu1 %v3642_v0 }
 0xb80   :  { %3276 = vmatpush3.bf16.msra.mxu1 %v4058_v48  ;;  %v3295_v48 = vpack.c.bf16 %v1680_v45, %v1679_v1 }
 0xb81   :  { %3277 = vmatprep.subr.bf16.mxu1 %v3642_v0 }
 0xb82   :  { %3296 = vmatprep.subr.bf16.mxu0 %v3295_v48 }
 0xb84   :  { %3279 = vmatpush3.bf16.msra.mxu1 %v4062_v51 }
 0xb85   :  { %3280 = vmatprep.subr.bf16.mxu1 %v3642_v0 }
 0xb88   :  { %3282 = vmatpush3.bf16.msra.mxu1 %v4066_v56  ;;  %v1682_v56 = vld [vmem:[#allocation15 + $0x18] sm:$0xff] }
 0xb89   :  { %3283 = vmatprep.subr.bf16.mxu1 %v3642_v0  ;;  %v3299_v57 = vpack.c.bf16 %v1682_v56, %v1681_v54 }
 0xb8c   :  { %3285 = vmatpush3.bf16.msra.mxu1 %v4070_v59  ;;  %v1683_v59 = vld [vmem:[#allocation15 + $0x20] sm:$0xff] }
 0xb8d   :  { %3286 = vmatprep.subr.bf16.mxu1 %v3642_v0 }
 0xb90   :  { %3288 = vmatpush3.bf16.msra.mxu1 %v4074_v62  ;;  %v1686_v62 = vld [vmem:[#allocation15 + $0x38] sm:$0xff] }
 0xb91   :  { %3289 = vmatprep.subr.bf16.mxu1 %v3642_v0  ;;  %v3307_v63 = vpack.c.bf16 %v1686_v62, %v1685_v61 }
 0xb94   :  { %3291 = vmatpush3.bf16.msra.mxu1 %v4078_v3  ;;  %v1688_v3 = vld [vmem:[#allocation15 + $0x48] sm:$0xff] }
 0xb95   :  { %3292 = vmatprep.subr.bf16.mxu1 %v3642_v0  ;;  %v3303_v0 = vpack.c.bf16 %v1684_v60, %v1683_v59  ;;  %v3311_v4 = vpack.c.bf16 %v1688_v3, %v1687_v2 }
 0xb98   :  { %3294 = vmatpush3.bf16.msra.mxu1 %v4082_v6  ;;  %v1690_v6 = vld [vmem:[#allocation15 + $0x58] sm:$0xff] }
 0xb99   :  { %v3315_v7 = vpack.c.bf16 %v1690_v6, %v1689_v5 }
 0xc4e   :  { %v1522_v50 = vpop.f32.mrb[28].mxu1 }
 0xc4f   :  { %v1526_v51 = vadd.f32 %v1522_v50, %v1064_v49  ;;  %v2756_v52 = vpop.f32.mrb[29].mxu1 }
 0xc51   :  { %3369 = vtanh.f32 %v1526_v51 }
 0xc5b   :  { %v3370_v58 = vpop.eup %3369 }
 0xc5c   :  { %2790 = vmatmul.mubr.f32.vlgmr.msra.gmra.mrb[14].mxu0 %v3370_v58 }
 0xc5d   :  { %3298 = vmatpush3.bf16.msra.mxu0 %v3295_v48  ;;  %2859 = vmatprep.mubr.f32.mxu0 %v4140_v25 }
 0xc5e   :  { %3300 = vmatprep.subr.bf16.mxu0 %v3299_v57 }
 0xc61   :  { %3302 = vmatpush3.bf16.msra.mxu0 %v3299_v57 }
 0xc62   :  { %3304 = vmatprep.subr.bf16.mxu0 %v3303_v0 }
 0xc65   :  { %3306 = vmatpush3.bf16.msra.mxu0 %v3303_v0 }
 0xc66   :  { %3308 = vmatprep.subr.bf16.mxu0 %v3307_v63 }
 0xc69   :  { %3310 = vmatpush3.bf16.msra.mxu0 %v3307_v63 }
 0xc6a   :  { %3312 = vmatprep.subr.bf16.mxu0 %v3311_v4 }
 0xc6d   :  { %3314 = vmatpush3.bf16.msra.mxu0 %v3311_v4 }
 0xc6e   :  { %3316 = vmatprep.subr.bf16.mxu0 %v3315_v7 }
 0xc71   :  { %3318 = vmatpush3.bf16.msra.mxu0 %v3315_v7 }
 0xc72   :  { %3320 = vmatprep.subr.bf16.mxu0 %v3319_v10 }
 0xc75   :  { %3322 = vmatpush3.bf16.msra.mxu0 %v3319_v10 }
 0xc76   :  { %3324 = vmatprep.subr.bf16.mxu0 %v3323_v13 }
 0xc79   :  { %3326 = vmatpush3.bf16.msra.mxu0 %v3323_v13 }
 0xc7c   :  { %2860 = vmatmul.mubr.f32.vlgmr.msra.gmra.mrb[16].mxu0 %v4167_v31 }
 0xc7d   :  { %2862 = vmatprep.mubr.f32.mxu0 %v4190_v36 }
 0xc80   :  { %2863 = vmatmul.mubr.f32.gmra.mrb[18].mxu0 %v4213_v41 }
 0xc81   :  { %2865 = vmatprep.mubr.f32.mxu0 %v4235_v47 }
 0xc84   :  { %2866 = vmatmul.mubr.f32.gmra.mrb[20].mxu0 %v3370_v58 }
 0xd2f   :  { %v1596_v16 = vpop.f32.mrb[14].mxu0 }
 0xd30   :  { %v1600_v11 = vadd.f32 %v1596_v16, %v1069_v15  ;;  %v2791_v14 = vpop.f32.mrb[15].mxu0 }
 0xd32   :  { %3371 = vtanh.f32 %v1600_v11 }
 0xd3c   :  { %v3372_v17 = vpop.eup %3371 }
 0xd3d   :  { %2825 = vmatmul.mubr.f32.vlgmr.msra.gmra.mrb[30].mxu1 %v3372_v17  ;;  %2868 = vmatprep.mubr.f32.mxu0 %v3372_v17 }
 0xd4f   :  { %v2861_v19 = vpop.f32.mrb[16].mxu0 }
 0xd50   :  { %v1782_v21 = vadd.f32 %v2861_v19, %v1870_v18  ;;  %v1776_v22 = vpop.f32.mrb[17].mxu0 }
 0xd51   :  { %v1777_v23 = vadd.f32 %v1870_v18, %v1776_v22 }
 0xd52   :  { %1816 = vst [vmem:[#allocation18 + $0x8] sm:$0xff] %v1782_v21 }
 0xd53   :  { %1815 = vst [vmem:[#allocation18] sm:$0xff] %v1777_v23  ;;  %v2864_v24 = vpop.f32.mrb[18].mxu0 }
 0xd54   :  { %v1792_v25 = vadd.f32 %v2864_v24, %v1870_v18  ;;  %v1786_v27 = vpop.f32.mrb[19].mxu0 }
 0xd55   :  { %v1787_v28 = vadd.f32 %v1870_v18, %v1786_v27 }
 0xd56   :  { %1818 = vst [vmem:[#allocation18 + $0x18] sm:$0xff] %v1792_v25 }
 0xd57   :  { %1817 = vst [vmem:[#allocation18 + $0x10] sm:$0xff] %v1787_v28  ;;  %v2867_v26 = vpop.f32.mrb[20].mxu0 }
 0xd58   :  { %v1802_v29 = vadd.f32 %v2867_v26, %v1870_v18  ;;  %v1796_v30 = vpop.f32.mrb[21].mxu0 }
 0xd59   :  { %v1797_v31 = vadd.f32 %v1870_v18, %v1796_v30 }
 0xd5a   :  { %1820 = vst [vmem:[#allocation18 + $0x28] sm:$0xff] %v1802_v29 }
 0xd5b   :  { %1819 = vst [vmem:[#allocation18 + $0x20] sm:$0xff] %v1797_v31 }
 0xe10   :  { %v1670_v33 = vpop.f32.mrb[30].mxu1 }
 0xe11   :  { %v1674_v34 = vadd.f32 %v1670_v33, %v1074_v32  ;;  %v2826_v35 = vpop.f32.mrb[31].mxu1 }
 0xe13   :  { %3373 = vtanh.f32 %v1674_v34 }
 0xe1d   :  { %v3374_v36 = vpop.eup %3373 }
 0xe1e   :  { %1678 = vst [vmem:[#allocation19 + $0x8] sm:$0xff] %v3374_v36  ;;  %2869 = vmatmul.mubr.f32.gmra.mrb[22].mxu0 %v3374_v36 }
 0xe1f   :  { %3584 = shalt.err (!%p3581_p6)
}
 0xe20   :  { %s3585_s14 = scalar_lea.hbm %s4306_s10, 256 }
 0xe21   :  { %p3586_p7 = scmp.ne.s32.totalorder %s4306_s10, %s3585_s14  ;;  %p3589_p8 = scmp.lt.u32.totalorder %s3585_s14, %s4306_s10 }
 0xe23   :  { %p3591_p9 = pnand %p3589_p8, %p3586_p7 }
 0xe25   :  { %3594 = shalt.err (!%p3591_p9)
}
 0xe26   :  { %1846 = dma.vmem_to_hbm [thread:$0]  %s1841_s29, 256, %s4306_s10, [#allocation20], %s3633_s25, %s3633_s25, %s3634_s26  }
 0xe27   :  { %s3646_s4 = smov [#allocation18]  }
 0xe28   :  { %s1828_s24 = sshll.u32 %s3646_s4, 4  ;;  %s1829_s24 = int_to_ptr.vmem [resolvable:$true] %s1828_s24 }
 0xe29   :  { %s3595_s27 = scalar_lea.vmem %s1829_s24, 1024  ;;  %p3600_p11 = scmp.lt.s32.totalorder %s1829_s24, %s1829_s24 }
 0xe2a   :  { %p3596_p10 = scmp.ne.s32.totalorder %s1829_s24, %s3595_s27  ;;  %p3601_p12 = scmp.lt.s32.totalorder %s3595_s27, %s3595_s27 }
 0xe2c   :  { %p3602_p13 = por %p3601_p12, %p3600_p11 }
 0xe2e   :  { %p3603_p0 = pnand %p3602_p13, %p3596_p10 }
 0xef1   :  { %v2870_v20 = vpop.f32.mrb[22].mxu0 }
 0xef2   :  { %v1812_v53 = vadd.f32 %v2870_v20, %v1870_v18  ;;  %v1806_v37 = vpop.f32.mrb[23].mxu0 }
 0xef3   :  { %v1807_v38 = vadd.f32 %v1870_v18, %v1806_v37 }
 0xef4   :  { %1822 = vst [vmem:[#allocation18 + $0x38] sm:$0xff] %v1812_v53 }
 0xef5   :  { %1821 = vst [vmem:[#allocation18 + $0x30] sm:$0xff] %v1807_v38 }
 0xef6   :  { %3606 = shalt.err (!%p3603_p0)
}
 0xef7   :  { %s3607_s10 = scalar_lea.hbm %s4305_s9, 1024 }
 0xef8   :  { %p3608_p1 = scmp.ne.s32.totalorder %s4305_s9, %s3607_s10  ;;  %p3611_p2 = scmp.lt.u32.totalorder %s3607_s10, %s4305_s9 }
 0xefa   :  { %p3613_p3 = pnand %p3611_p2, %p3608_p1 }
 0xefc   :  { %3616 = shalt.err (!%p3613_p3)
}
 0xefd   :  { %1834 = dma.vmem_to_hbm [thread:$0]  %s1829_s24, 1024, %s4305_s9, [#allocation5], %s3633_s25, %s3633_s25, %s3634_s26  }
 0xefe   :  { %3627 = dma.done.wait [#allocation5], 1024  }
 0xeff   :  { %3628 = vsyncadd [#allocation5], 4294966272 }
 0xf00   :  { %3629 = dma.done.wait [#allocation20], 256  }
 0xf01   :  { %3630 = vsyncadd [#allocation20], 4294967040 }
 0xf02   :  { %1853 = vsyncpa [#allocation4], 1 }
 0xf03   :  { %1854 = vsyncpa [#allocation7], 1 }
 0xf04   :  { %1855 = vsyncpa [#allocation10], 1 }
 0xf05   :  { %1856 = vsyncpa [#allocation13], 1 }
 0xf06   :  { %1857 = vsyncpa [#allocation16], 1 }
 0xf07   :  { %1858 = vsyncpa [#allocation5], 1 }
 0xf08   :  { %1859 = vsyncpa [#allocation20], 1 }

</bundles_post_ra>
